<compile_context>
chip_gen: v7x
topology: tpu7x:2x2x1
jax: 0.10.0
libtpu: 0.0.40
codegen_flags: <defaults>
</compile_context>

<pallas_src>
import jax
import jax.numpy as jnp
from jax.experimental import pallas as pl
from jax.experimental.pallas import tpu as pltpu

_PAD = 128  # lane-dense padded feature width


def _autoencoder_kernel(x_ref, w_ref, b_ref, out_ref):
    """Whole encode+decode chain for one batch tile, entirely in VMEM.

    Hot path = 4 MXU matmuls (bf16 operands, f32 accumulation) + 2 tanh (EUP)
    + bias adds (VPU), all fused.
    """
    x = x_ref[...]                                                    # (bm, 128) bf16

    # encoder: Linear -> Tanh -> Linear
    h = jnp.dot(x, w_ref[0], preferred_element_type=jnp.float32) + b_ref[0]
    h = jnp.tanh(h)                                                   # f32, EUP
    z = jnp.dot(h.astype(jnp.bfloat16), w_ref[1],
                preferred_element_type=jnp.float32) + b_ref[1]

    # decoder: Linear -> Tanh -> Linear
    h = jnp.dot(z.astype(jnp.bfloat16), w_ref[2],
                preferred_element_type=jnp.float32) + b_ref[2]
    h = jnp.tanh(h)
    y = jnp.dot(h.astype(jnp.bfloat16), w_ref[3],
                preferred_element_type=jnp.float32) + b_ref[3]

    out_ref[...] = y.astype(out_ref.dtype)                            # lane-dense f32 store


def _round_up(n, m):
    return (n + m - 1) // m * m


def _pack_params(params):
    """Zero-pad each (in,out) weight to (128,128) and bias to (1,128); stack so the
    weights arrive as a single bf16 DMA slab and the biases as a single f32 slab."""
    ws, bs = [], []
    for idx in range(1, 5):
        w = params[f"w{idx}"]
        b = params[f"b{idx}"].reshape(1, -1)
        fi, fo = w.shape
        w_pad = jnp.zeros((_PAD, _PAD), jnp.float32).at[:fi, :fo].set(w)
        b_pad = jnp.zeros((1, _PAD), jnp.float32).at[:, :fo].set(b)
        ws.append(w_pad.astype(jnp.bfloat16))
        bs.append(b_pad)
    return jnp.stack(ws), jnp.stack(bs)   # (4,128,128) bf16, (4,1,128) f32


def autoencoder_forward(x, params, *, block_batch=512):
    """params = dict with w1..w4 as (in,out) and b1..b4 as (1,out) (or (out,))."""
    batch, feat_in = x.shape
    feat_out = params["w4"].shape[1]
    assert feat_in <= _PAD and feat_out <= _PAD, "feature dims must fit one 128-lane tile"

    w_stack, b_stack = _pack_params(params)

    # Pick the batch tile: large (MXU/DMA friendly) but never larger than needed;
    # keep it a multiple of 8 sublanes. Batch is zero-padded up to a tile multiple.
    bm = min(block_batch, _round_up(batch, 8))
    pbatch = _round_up(batch, bm)

    x_pad = jnp.zeros((pbatch, _PAD), jnp.bfloat16)
    x_pad = x_pad.at[:batch, :feat_in].set(x.astype(jnp.bfloat16))

    grid = (pbatch // bm,)

    flops = 2 * pbatch * _PAD * _PAD * 4                      # 4 padded matmuls
    transcendentals = 2 * pbatch * _PAD                       # 2 tanh layers
    bytes_accessed = (x_pad.size * 2                          # bf16 in
                      + pbatch * _PAD * 4                     # f32 out
                      + w_stack.size * 2 + b_stack.size * 4)  # resident params

    out = pl.pallas_call(
        _autoencoder_kernel,
        out_shape=jax.ShapeDtypeStruct((pbatch, _PAD), jnp.float32),
        grid_spec=pltpu.PrefetchScalarGridSpec(
            num_scalar_prefetch=0,
            grid=grid,
            in_specs=[
                pl.BlockSpec((bm, _PAD), lambda i: (i, 0)),          # activation stream
                pl.BlockSpec((4, _PAD, _PAD), lambda i: (0, 0, 0)),  # all weights, 1 DMA
                pl.BlockSpec((4, 1, _PAD), lambda i: (0, 0, 0)),     # all biases,  1 DMA
            ],
            out_specs=pl.BlockSpec((bm, _PAD), lambda i: (i, 0)),
        ),
        compiler_params=pltpu.CompilerParams(
            dimension_semantics=("parallel",)),
        cost_estimate=pl.CostEstimate(
            flops=flops,
            transcendentals=transcendentals,
            bytes_accessed=bytes_accessed),
    )(x_pad, w_stack, b_stack)

    return out[:batch, :feat_out]


def init_params(key, encoder_layers=(100, 100, 20), decoder_layers=(20, 100, 100)):
    """Deterministic init mimicking nn.Linear's U(-1/sqrt(fan_in), 1/sqrt(fan_in))."""
    layer_shapes = list(zip(encoder_layers, encoder_layers[1:])) + \
                   list(zip(decoder_layers, decoder_layers[1:]))
    params = {}
    for idx, (fan_in, fan_out) in enumerate(layer_shapes, start=1):
        key, kw, kb = jax.random.split(key, 3)
        bound = 1.0 / jnp.sqrt(jnp.float32(fan_in))
        params[f"w{idx}"] = jax.random.uniform(
            kw, (fan_in, fan_out), jnp.float32, -bound, bound)
        params[f"b{idx}"] = jax.random.uniform(
            kb, (1, fan_out), jnp.float32, -bound, bound)
    return params


def reference_forward(x, params):
    """Plain-JAX reference with the same mixed-precision semantics as the kernel
    (bf16 matmul operands, f32 accumulation, f32 bias/tanh)."""
    def lin(a, w, b):
        return jnp.dot(a.astype(jnp.bfloat16), w.astype(jnp.bfloat16),
                       preferred_element_type=jnp.float32) + b
    h = jnp.tanh(lin(x, params["w1"], params["b1"]))
    z = lin(h, params["w2"], params["b2"])
    h = jnp.tanh(lin(z, params["w3"], params["b3"]))
    return lin(h, params["w4"], params["b4"])


if __name__ == "__main__":
    key = jax.random.PRNGKey(0)
    kx, kp = jax.random.split(key)

    encoder_layers = (100, 100, 20)
    decoder_layers = (20, 100, 100)
    batch = 1024   # 2 grid steps at block_batch=512 -> both TCs busy on v7x

    params = init_params(kp, encoder_layers, decoder_layers)
    x = jax.random.normal(kx, (batch, encoder_layers[0]), jnp.float32)

    out = autoencoder_forward(x, params, block_batch=512)
    out = jax.block_until_ready(out)

    ref = reference_forward(x, params)
    assert out.shape == (batch, decoder_layers[-1])
    assert jnp.allclose(out, ref, atol=1e-2, rtol=1e-2), "mismatch vs reference"

    print("KERNEL_OK")
</pallas_src>

<mosaic_0001>
module attributes {stable_mosaic.version = 11 : i64} {
  func.func @_autoencoder_kernel(%arg0: i32, %arg1: memref<512x128xbf16, #tpu.memory_space<vmem>>, %arg2: memref<4x128x128xbf16, #tpu.memory_space<vmem>>, %arg3: memref<4x1x128xf32, #tpu.memory_space<vmem>>, %arg4: memref<512x128xf32, #tpu.memory_space<vmem>>) attributes {dimension_semantics = [#tpu.dimension_semantics<parallel>], iteration_bounds = array<i64: 2>, scalar_prefetch = 0 : i64, scratch_operands = 0 : i64, tpu.core_type = #tpu.core_type<tc>, window_params = [{transform_indices = @transform_0, window_bounds = array<i64: 512, 128>}, {pipeline_mode = #tpu.pipeline_mode<synchronous>, transform_indices = @transform_1, window_bounds = array<i64: 4, 128, 128>}, {pipeline_mode = #tpu.pipeline_mode<synchronous>, transform_indices = @transform_2, window_bounds = array<i64: 4, 1, 128>}, {transform_indices = @transform_3, window_bounds = array<i64: 512, 128>}]} {
    %c0 = arith.constant 0 : index
    %c0_0 = arith.constant 0 : index
    %0 = vector.load %arg1[%c0, %c0_0] : memref<512x128xbf16, #tpu.memory_space<vmem>>, vector<512x128xbf16>
    %c0_1 = arith.constant 0 : index
    %c0_2 = arith.constant 0 : index
    %c0_3 = arith.constant 0 : index
    %1 = vector.load %arg2[%c0_1, %c0_2, %c0_3] : memref<4x128x128xbf16, #tpu.memory_space<vmem>>, vector<1x128x128xbf16>
    %2 = vector.shape_cast %1 : vector<1x128x128xbf16> to vector<128x128xbf16>
    %cst = arith.constant dense<0.000000e+00> : vector<512x128xf32>
    %3 = tpu.matmul %0, %2, %cst {dimension_numbers = #tpu.dot_dimension_numbers<[1], [0], [0], [1], [0, 0, 1, 1], [], []>} : vector<512x128xbf16>, vector<128x128xbf16>, vector<512x128xf32> -> vector<512x128xf32>
    %c0_4 = arith.constant 0 : index
    %c0_5 = arith.constant 0 : index
    %c0_6 = arith.constant 0 : index
    %4 = vector.load %arg3[%c0_4, %c0_5, %c0_6] : memref<4x1x128xf32, #tpu.memory_space<vmem>>, vector<1x1x128xf32>
    %5 = vector.shape_cast %4 : vector<1x1x128xf32> to vector<1x128xf32>
    %6 = vector.broadcast %5 : vector<1x128xf32> to vector<512x128xf32>
    %7 = arith.addf %3, %6 : vector<512x128xf32>
    %8 = math.tanh %7 : vector<512x128xf32>
    %9 = arith.truncf %8 : vector<512x128xf32> to vector<512x128xbf16>
    %c1 = arith.constant 1 : index
    %c0_7 = arith.constant 0 : index
    %c0_8 = arith.constant 0 : index
    %10 = vector.load %arg2[%c1, %c0_7, %c0_8] : memref<4x128x128xbf16, #tpu.memory_space<vmem>>, vector<1x128x128xbf16>
    %11 = vector.shape_cast %10 : vector<1x128x128xbf16> to vector<128x128xbf16>
    %cst_9 = arith.constant dense<0.000000e+00> : vector<512x128xf32>
    %12 = tpu.matmul %9, %11, %cst_9 {dimension_numbers = #tpu.dot_dimension_numbers<[1], [0], [0], [1], [0, 0, 1, 1], [], []>} : vector<512x128xbf16>, vector<128x128xbf16>, vector<512x128xf32> -> vector<512x128xf32>
    %c1_10 = arith.constant 1 : index
    %c0_11 = arith.constant 0 : index
    %c0_12 = arith.constant 0 : index
    %13 = vector.load %arg3[%c1_10, %c0_11, %c0_12] : memref<4x1x128xf32, #tpu.memory_space<vmem>>, vector<1x1x128xf32>
    %14 = vector.shape_cast %13 : vector<1x1x128xf32> to vector<1x128xf32>
    %15 = vector.broadcast %14 : vector<1x128xf32> to vector<512x128xf32>
    %16 = arith.addf %12, %15 : vector<512x128xf32>
    %17 = arith.truncf %16 : vector<512x128xf32> to vector<512x128xbf16>
    %c2 = arith.constant 2 : index
    %c0_13 = arith.constant 0 : index
    %c0_14 = arith.constant 0 : index
    %18 = vector.load %arg2[%c2, %c0_13, %c0_14] : memref<4x128x128xbf16, #tpu.memory_space<vmem>>, vector<1x128x128xbf16>
    %19 = vector.shape_cast %18 : vector<1x128x128xbf16> to vector<128x128xbf16>
    %cst_15 = arith.constant dense<0.000000e+00> : vector<512x128xf32>
    %20 = tpu.matmul %17, %19, %cst_15 {dimension_numbers = #tpu.dot_dimension_numbers<[1], [0], [0], [1], [0, 0, 1, 1], [], []>} : vector<512x128xbf16>, vector<128x128xbf16>, vector<512x128xf32> -> vector<512x128xf32>
    %c2_16 = arith.constant 2 : index
    %c0_17 = arith.constant 0 : index
    %c0_18 = arith.constant 0 : index
    %21 = vector.load %arg3[%c2_16, %c0_17, %c0_18] : memref<4x1x128xf32, #tpu.memory_space<vmem>>, vector<1x1x128xf32>
    %22 = vector.shape_cast %21 : vector<1x1x128xf32> to vector<1x128xf32>
    %23 = vector.broadcast %22 : vector<1x128xf32> to vector<512x128xf32>
    %24 = arith.addf %20, %23 : vector<512x128xf32>
    %25 = math.tanh %24 : vector<512x128xf32>
    %26 = arith.truncf %25 : vector<512x128xf32> to vector<512x128xbf16>
    %c3 = arith.constant 3 : index
    %c0_19 = arith.constant 0 : index
    %c0_20 = arith.constant 0 : index
    %27 = vector.load %arg2[%c3, %c0_19, %c0_20] : memref<4x128x128xbf16, #tpu.memory_space<vmem>>, vector<1x128x128xbf16>
    %28 = vector.shape_cast %27 : vector<1x128x128xbf16> to vector<128x128xbf16>
    %cst_21 = arith.constant dense<0.000000e+00> : vector<512x128xf32>
    %29 = tpu.matmul %26, %28, %cst_21 {dimension_numbers = #tpu.dot_dimension_numbers<[1], [0], [0], [1], [0, 0, 1, 1], [], []>} : vector<512x128xbf16>, vector<128x128xbf16>, vector<512x128xf32> -> vector<512x128xf32>
    %c3_22 = arith.constant 3 : index
    %c0_23 = arith.constant 0 : index
    %c0_24 = arith.constant 0 : index
    %30 = vector.load %arg3[%c3_22, %c0_23, %c0_24] : memref<4x1x128xf32, #tpu.memory_space<vmem>>, vector<1x1x128xf32>
    %31 = vector.shape_cast %30 : vector<1x1x128xf32> to vector<1x128xf32>
    %32 = vector.broadcast %31 : vector<1x128xf32> to vector<512x128xf32>
    %33 = arith.addf %29, %32 : vector<512x128xf32>
    %c0_25 = arith.constant 0 : index
    %c0_26 = arith.constant 0 : index
    %34 = vector.load %arg4[%c0_25, %c0_26] : memref<512x128xf32, #tpu.memory_space<vmem>>, vector<512x128xf32>
    tpu.vector_store %arg4[%c0_25, %c0_26], %33 {strides = array<i32>} : memref<512x128xf32, #tpu.memory_space<vmem>>, vector<512x128xf32>,
    return
  }
  func.func @transform_0(%arg0: i32) -> (i32, i32) {
    %c0_i32 = arith.constant 0 : i32
    %c0_i32_0 = arith.constant 0 : i32
    return %arg0, %c0_i32 : i32, i32
  }
  func.func @transform_1(%arg0: i32) -> (i32, i32, i32) {
    %c0_i32 = arith.constant 0 : i32
    %c0_i32_0 = arith.constant 0 : i32
    %c0_i32_1 = arith.constant 0 : i32
    %c0_i32_2 = arith.constant 0 : i32
    return %c0_i32, %c0_i32_0, %c0_i32_1 : i32, i32, i32
  }
  func.func @transform_2(%arg0: i32) -> (i32, i32, i32) {
    %c0_i32 = arith.constant 0 : i32
    %c0_i32_0 = arith.constant 0 : i32
    %c0_i32_1 = arith.constant 0 : i32
    %c0_i32_2 = arith.constant 0 : i32
    return %c0_i32, %c0_i32_0, %c0_i32_1 : i32, i32, i32
  }
  func.func @transform_3(%arg0: i32) -> (i32, i32) {
    %c0_i32 = arith.constant 0 : i32
    %c0_i32_0 = arith.constant 0 : i32
    return %arg0, %c0_i32 : i32, i32
  }
}

</mosaic_0001>

<bundles_post_ra>
// kernel: tpu_custom_call.1
= control target key start
LH: loop header
LB: loop body
LE: loop exit
PB: predicated region body
PF: predicated region fallthrough
CT: control target
= control target key end

     0   :  { %8 = vsyncpa [#allocation3], 0  ;;  %s3986_s0 = inlined_call_operand.hbm [shape: bf16[1024,128], index: 0, kind: input, shape index: {}]   ;;  %s3987_s1 = inlined_call_operand.hbm [shape: bf16[4,128,128], index: 1, kind: input, shape index: {}]   ;;  %s3988_s2 = inlined_call_operand.vmem [shape: f32[4,1,128], index: 2, kind: input, shape index: {}]   ;;  %s3989_s3 = inlined_call_operand.hbm [shape: f32[1024,128], index: 3, kind: output, shape index: {}]  }
   0x1   :  { %10 = vsyncpa [#allocation3 + $0x1], 0 }
   0x2   :  { %11 = vsyncpa [#allocation6], 0 }
   0x3   :  { %12 = vsyncpa [#allocation4], 0 }
   0x4   :  { %14 = vsyncpa [#allocation4 + $0x1], 0  ;;  %s3401_s12 = smov 0   ;;  %s3403_s13 = smov 0  }
   0x5   :  { %s3405_s14 = smov 0   ;;  %s3407_s15 = smov 0  }
   0x6 LB: > { %s3422_s16 = sadd.s32 4294967295, %s3372_s15   ;;  %s2294_s17 = sadd.s32 4294967294, %s3372_s15   ;;  %s3372_s15 = sphi %s3407_s15, %s4009_s15   ;;  %s3368_s14 = sphi %s3405_s14, %s4008_s14   ;;  %s3364_s13 = sphi %s3403_s13, %s4007_s13   ;;  %s3360_s12 = sphi %s3401_s12, %s4006_s12  }
   0x7   : > { %p40_p0 = scmp.ne.s32.totalorder %s3364_s13, %s3360_s12  ;;  %p3990_p1 = scmp.eq.s32.totalorder %s3422_s16, 0 }
   0x8   : > { %p112_p3 = scmp.eq.s32.totalorder %s2294_s17, 1  ;;  %p2295_p5 = scmp.ge.s32.totalorder %s3372_s15, 1 }
   0x9   : > { %p3431_p4 = por %p3990_p1, %p40_p0  ;;  %p119_p7 = scmp.lt.s32.totalorder %s3372_s15, 3 }
   0xa   : > { %p3436_p6 = por %p112_p3, %p40_p0  ;;  %s3374_s21 = smov [#allocation5]  }
   0xb   : > { %s3993_s18 = scalar_select %p3431_p4, 1, 0 }
   0xc   : > { %s3994_s19 = scalar_select %p3436_p6, 1, 0 }
   0xd   : > { %p3441_p8 = pnand %p2295_p5, %p119_p7  ;;  %s131_s22 = sshll.u32 %s3374_s21, 4  ;;  %s3445_s22 = int_to_ptr.vmem [resolvable:$true] %s131_s22 }
   0xe   : > { %s3457_s24 = sadd.s32 1, %s3372_s15   ;;  %s27_s25 = sadd.s32 1, %s3368_s14 }
   0xf   : > { %s3995_s20 = scalar_select %p3441_p8, 1, 0 }
  0x10   : > { %p2871_p9 = pneg %p3441_p8  ;;  %s24_s26 = ssub.s32 %s3372_s15, %s3457_s24 }
  0x11   : > { %s3244_s29 = scalar_lea.hbm %s3987_s1, 4096 }
  0x12   : > { %p3452_p11 = pnand %p2871_p9, %p3990_p1  ;;  %p3245_p12 = scmp.ne.s32.totalorder %s3987_s1, %s3244_s29 }
  0x13   : > { %p3251_p5 = scmp.lt.u32.totalorder %s3244_s29, %s3987_s1 }
  0x14   : > { %p3246_p13 = pneg %p3452_p11 }
  0x16   : > { %p3247_p0 = pnand %p3246_p13, %p3245_p12 }
  0x18   : > { %p3248_p3 = pneg %p3247_p0 }
  0x1a   : > { %p3253_p7 = pnand %p3251_p5, %p3248_p3 }
  0x1c   : > { %3256 = shalt.err (!%p3253_p7)
}
  0x1d   : > { %s3257_s7 = scalar_lea.vmem %s3445_s22, 4096  ;;  %p3265_p2 = scmp.lt.s32.totalorder %s3445_s22, %s3445_s22 }
  0x1e   : > { %p3258_p9 = scmp.ne.s32.totalorder %s3445_s22, %s3257_s7  ;;  %p3266_p6 = scmp.lt.s32.totalorder %s3257_s7, %s3257_s7 }
  0x20   : > { %p3260_p10 = pnand %p3258_p9, %p3246_p13  ;;  %p3267_p4 = por %p3266_p6, %p3265_p2 }
  0x22   : > { %p3261_p1 = pneg %p3260_p10 }
  0x24   : > { %p3268_p8 = pnand %p3267_p4, %p3261_p1 }
  0x26   : > { %3271 = shalt.err (!%p3268_p8)
}
  0x27   : > { %s3375_s8 = smov 64   ;;  %s3376_s9 = smov 4  }
  0x28   : > { %2874 = dma.hbm_to_vmem [thread:$0]  (!%p3452_p11), %s3987_s1, 4096, %s3445_s22, [#allocation6], %s3375_s8, %s3375_s8, %s3376_s9  }
  0x29   : > { %p25_p1 = scmp.eq.s32.totalorder %s24_s26, 0  ;;  %p34_p2 = scmp.ne.s32.totalorder %s3368_s14, %s3364_s13 }
  0x2a   : > { %p35_p4 = scmp.eq.s32.totalorder %s3372_s15, 0  ;;  %p2884_p6 = scmp.lt.s32.totalorder %s3372_s15, 2 }
  0x2b   : > { %s3491_s17 = scalar_select %p25_p1, %s3368_s14, %s27_s25  }
  0x2c   : > { %p36_p8 = por %p35_p4, %p34_p2  ;;  %p3997_p10 = scmp.eq.s32.totalorder %s3422_s16, 1 }
  0x2d   : > { %s148_s23 = sand.u32 1, %s3368_s14   ;;  %s2381_s27 = sshll.u32 %s3372_s15, 12 }
  0x2e   : > { %p3495_p12 = por %p3997_p10, %p34_p2  ;;  %s2298_s28 = sshll.u32 %s148_s23, 8 }
  0x2f   : > { %s3504_s4 = scalar_lea.hbm %s3986_s0, %s2381_s27  ;;  %s152_s22 = scalar_lea.vmem [#allocation2], %s2298_s28 }
  0x30   : > { %s159_s25 = sshll.u32 %s152_s22, 4  ;;  %p3506_p11 = pnand %p2884_p6, %p36_p8  ;;  %s3510_s25 = int_to_ptr.vmem [resolvable:$true] %s159_s25 }
  0x31   : > { %s3512_s5 = scalar_lea.sflag [#allocation3], %s148_s23  ;;  %s3272_s6 = scalar_lea.hbm %s3504_s4, 4096 }
  0x32   : > { %p3273_p13 = scmp.ne.s32.totalorder %s3504_s4, %s3272_s6  ;;  %p3274_p0 = pneg %p3506_p11 }
  0x33   : > { %s3277_s11 = scalar_lea.hbm %s3986_s0, 8192  ;;  %p3278_p7 = scmp.lt.u32.totalorder %s3504_s4, %s3986_s0 }
  0x34   : > { %p3275_p3 = pnand %p3274_p0, %p3273_p13  ;;  %p3279_p9 = scmp.lt.u32.totalorder %s3277_s11, %s3272_s6 }
  0x35   : > { %p3281_p2 = scmp.lt.u32.totalorder %s3272_s6, %s3504_s4 }
  0x36   : > { %p3276_p5 = pneg %p3275_p3  ;;  %p3280_p1 = por %p3279_p9, %p3278_p7 }
  0x38   : > { %p3282_p4 = por %p3281_p2, %p3280_p1 }
  0x3a   : > { %p3283_p6 = pnand %p3282_p4, %p3276_p5 }
  0x3c   : > { %3286 = shalt.err (!%p3283_p6)
}
  0x3d   : > { %s3287_s23 = scalar_lea.vmem %s3510_s25, 4096  ;;  %s3377_s29 = smov [#allocation2]  }
  0x3e   : > { %p3288_p8 = scmp.ne.s32.totalorder %s3510_s25, %s3287_s23  ;;  %s3292_s30 = sshll.u32 %s3377_s29, 4  ;;  %s3293_s30 = int_to_ptr.vmem [resolvable:$false] %s3292_s30 }
  0x3f   : > { %s3294_s22 = scalar_lea.vmem %s3293_s30, 8192  ;;  %p3295_p3 = scmp.lt.s32.totalorder %s3510_s25, %s3293_s30 }
  0x40   : > { %p3290_p10 = pnand %p3288_p8, %p3274_p0  ;;  %p3296_p7 = scmp.lt.s32.totalorder %s3294_s22, %s3287_s23 }
  0x42   : > { %p3291_p13 = pneg %p3290_p10  ;;  %p3297_p9 = por %p3296_p7, %p3295_p3 }
  0x44   : > { %p3298_p1 = pnand %p3297_p9, %p3291_p13 }
  0x46   : > { %3301 = shalt.err (!%p3298_p1)
}
  0x47   : > { %2878 = dma.hbm_to_vmem [thread:$0]  (!%p3506_p11), %s3504_s4, 4096, %s3510_s25, %s3512_s5, %s3375_s8, %s3375_s8, %s3376_s9  }
  0x48   : > { %p4000_p0 = scmp.ne.s32.totalorder %s3995_s20, 0 }
  0x49   : > { %s3546_s6 = sand.u32 (!%p4000_p0), 1, %s3364_s13   ;;  %p4001_p5 = scmp.ne.s32.totalorder (!%p4000_p0), %s3993_s18, 0 }
  0x4a   : > { %171 = sbr.rel (%p4000_p0) target bundleno = 1152 (0x480), region = 32  ;;  %s2302_s7 = sshll.u32 (!%p4000_p0), %s3546_s6, 8 }
  0x4b   : > { %s174_s10 = scalar_lea.sflag (!%p4000_p0), [#allocation3], %s3546_s6  ;;  %s3550_s11 = scalar_lea.vmem (!%p4000_p0), [#allocation2], %s2302_s7 }
  0x51   : > { %3347 = dma.done.wait (%p4001_p5), %s174_s10, 4096  }
  0x52   : > { %3349 = vsyncadd (%p4001_p5), %s174_s10, 4294963200  ;;  %p4002_p11 = scmp.eq.s32.totalorder %s3422_s16, 0 }
  0x54   : > { %3351 = dma.done.wait (%p4002_p11), [#allocation6], 4096   ;;  %p4003_p2 = pmov %p4002_p11 }
  0x55   : > { %v2924_v0 = vld [vmem:[#allocation5] sm:$0xff]   ;;  %v2925_v1 = vld [vmem:[#allocation5 + $0x8] sm:$0xff]   ;;  %v2926_v2 = vld [vmem:[#allocation5 + $0x10] sm:$0xff]   ;;  %s2304_s26 = sshll.u32 %s3546_s6, 9  ;;  %s2382_s23 = sshll.u32 %s3422_s16, 13 }
  0x56   : > { %3353 = vsyncadd (%p4003_p2), [#allocation6], 4294963200  ;;  %2543 = vmatprep.subr.bf16.mxu0 %v2924_v0  ;;  %v2927_v3 = vld [vmem:[#allocation5 + $0x18] sm:$0xff]   ;;  %v2932_v4 = vld [vmem:[%s3550_s11] sm:$0xff]   ;;  %s3807_s28 = scalar_lea.vmem [#allocation7], %s2304_s26  ;;  %s3936_s7 = scalar_lea.hbm %s3989_s3, %s2382_s23 }
  0x57   : > { %2544 = vmatpush3.bf16.msra.mxu0 %v2924_v0  ;;  %2559 = vmatprep.mubr.bf16.mxu0 %v2932_v4  ;;  %v2928_v5 = vld [vmem:[#allocation5 + $0x20] sm:$0xff]   ;;  %v2929_v6 = vld [vmem:[#allocation5 + $0x28] sm:$0xff]   ;;  %v2930_v7 = vld [vmem:[#allocation5 + $0x30] sm:$0xff]   ;;  %s2211_s29 = sshll.u32 %s3807_s28, 4  ;;  %s2198_s16 = scalar_lea.sflag [#allocation4], %s3546_s6  ;;  %s3938_s29 = int_to_ptr.vmem [resolvable:$true] %s2211_s29 }
  0x58   : > { %2545 = vmatprep.subr.bf16.mxu0 %v2925_v1  ;;  %v2931_v8 = vld [vmem:[#allocation5 + $0x38] sm:$0xff]   ;;  %v2933_v9 = vld [vmem:[%s3550_s11 + $0x8] sm:$0xff]   ;;  %v2934_v10 = vld [vmem:[%s3550_s11 + $0x10] sm:$0xff]   ;;  %s3302_s10 = scalar_lea.vmem %s3938_s29, 8192 }
  0x59   : > { %v2935_v11 = vld [vmem:[%s3550_s11 + $0x18] sm:$0xff]   ;;  %v2936_v12 = vld [vmem:[%s3550_s11 + $0x20] sm:$0xff]   ;;  %v2965_v14 = vld [vmem:[#allocation5 + $0x48] sm:$0xff]   ;;  %p3303_p4 = scmp.ne.s32.totalorder %s3938_s29, %s3302_s10 }
  0x5a   : > { %v2964_v13 = vld [vmem:[#allocation5 + $0x40] sm:$0xff]   ;;  %v2966_v15 = vld [vmem:[#allocation5 + $0x50] sm:$0xff]   ;;  %v2937_v16 = vld [vmem:[%s3550_s11 + $0x28] sm:$0xff]  }
  0x5b   : > { %2546 = vmatpush3.bf16.msra.mxu0 %v2925_v1  ;;  %2623 = vmatprep.subr.bf16.mxu1 %v2964_v13  ;;  %v2938_v17 = vld [vmem:[%s3550_s11 + $0x30] sm:$0xff]   ;;  %v2939_v18 = vld [vmem:[%s3550_s11 + $0x38] sm:$0xff]   ;;  %v2940_v19 = vld [vmem:[%s3550_s11 + $0x40] sm:$0xff]   ;;  %p3304_p6 = pnand %p3303_p4, %p3495_p12 }
  0x5c   : > { %2547 = vmatprep.subr.bf16.mxu0 %v2926_v2  ;;  %2624 = vmatpush3.bf16.msra.mxu1 %v2964_v13  ;;  %v2941_v20 = vld [vmem:[%s3550_s11 + $0x48] sm:$0xff]   ;;  %v2942_v21 = vld [vmem:[%s3550_s11 + $0x50] sm:$0xff]   ;;  %v2943_v22 = vld [vmem:[%s3550_s11 + $0x58] sm:$0xff]  }
  0x5d   : > { %2625 = vmatprep.subr.bf16.mxu1 %v2965_v14  ;;  %v2944_v23 = vld [vmem:[%s3550_s11 + $0x60] sm:$0xff]   ;;  %v2945_v24 = vld [vmem:[%s3550_s11 + $0x68] sm:$0xff]   ;;  %v2946_v25 = vld [vmem:[%s3550_s11 + $0x70] sm:$0xff]   ;;  %p3305_p8 = pneg %p3304_p6 }
  0x5e   : > { %v2947_v26 = vld [vmem:[%s3550_s11 + $0x78] sm:$0xff]   ;;  %v2948_v27 = vld [vmem:[%s3550_s11 + $0x80] sm:$0xff]   ;;  %v2949_v28 = vld [vmem:[%s3550_s11 + $0x88] sm:$0xff]  }
  0x5f   : > { %2548 = vmatpush3.bf16.msra.mxu0 %v2926_v2  ;;  %v2950_v29 = vld [vmem:[%s3550_s11 + $0x90] sm:$0xff]   ;;  %v2951_v30 = vld [vmem:[%s3550_s11 + $0x98] sm:$0xff]   ;;  %v2952_v31 = vld [vmem:[%s3550_s11 + $0xa0] sm:$0xff]  }
  0x60   : > { %2549 = vmatprep.subr.bf16.mxu0 %v2927_v3  ;;  %2626 = vmatpush3.bf16.msra.mxu1 %v2965_v14  ;;  %v2953_v32 = vld [vmem:[%s3550_s11 + $0xa8] sm:$0xff]   ;;  %v2954_v33 = vld [vmem:[%s3550_s11 + $0xb0] sm:$0xff]   ;;  %v2967_v34 = vld [vmem:[#allocation5 + $0x58] sm:$0xff]  }
  0x61   : > { %2627 = vmatprep.subr.bf16.mxu1 %v2966_v15  ;;  %v2955_v35 = vld [vmem:[%s3550_s11 + $0xb8] sm:$0xff]   ;;  %v2956_v36 = vld [vmem:[%s3550_s11 + $0xc0] sm:$0xff]   ;;  %v2969_v38 = vld [vmem:[#allocation5 + $0x68] sm:$0xff]  }
  0x62   : > { %v2968_v37 = vld [vmem:[#allocation5 + $0x60] sm:$0xff]   ;;  %v2957_v39 = vld [vmem:[%s3550_s11 + $0xc8] sm:$0xff]   ;;  %v2958_v40 = vld [vmem:[%s3550_s11 + $0xd0] sm:$0xff]  }
  0x63   : > { %2550 = vmatpush3.bf16.msra.mxu0 %v2927_v3  ;;  %v2970_v41 = vld [vmem:[#allocation5 + $0x70] sm:$0xff]   ;;  %v2971_v42 = vld [vmem:[#allocation5 + $0x78] sm:$0xff]   ;;  %v2960_v44 = vld [vmem:[%s3550_s11 + $0xe0] sm:$0xff]  }
  0x64   : > { %2551 = vmatprep.subr.bf16.mxu0 %v2928_v5  ;;  %2628 = vmatpush3.bf16.msra.mxu1 %v2966_v15  ;;  %v2959_v43 = vld [vmem:[%s3550_s11 + $0xd8] sm:$0xff]   ;;  %v2961_v45 = vld [vmem:[%s3550_s11 + $0xe8] sm:$0xff]   ;;  %v2962_v46 = vld [vmem:[%s3550_s11 + $0xf0] sm:$0xff]  }
  0x65   : > { %2629 = vmatprep.subr.bf16.mxu1 %v2967_v34  ;;  %v2963_v47 = vld [vmem:[%s3550_s11 + $0xf8] sm:$0xff]   ;;  %v2972_v48 = vld [vmem:[#allocation5 + $0x80] sm:$0xff]   ;;  %v2973_v50 = vld [vmem:[#allocation5 + $0x88] sm:$0xff]   ;;  %s3378_s11 = smov [#allocation7]  }
  0x66   : > { %v3595_v49 = vld [vmem:[%s3988_s2] ss:$0 sm:$0xff]  ;;  %v2974_v3 = vld [vmem:[#allocation5 + $0x90] sm:$0xff]   ;;  %v2975_v4 = vld [vmem:[#allocation5 + $0x98] sm:$0xff]   ;;  %s3306_s18 = sshll.u32 %s3378_s11, 4  ;;  %s3307_s18 = int_to_ptr.vmem [resolvable:$false] %s3306_s18 }
  0x67   : > { %2552 = vmatpush3.bf16.msra.mxu0 %v2928_v5  ;;  %s3308_s20 = scalar_lea.vmem %s3307_s18, 16384  ;;  %p3309_p10 = scmp.lt.s32.totalorder %s3938_s29, %s3307_s18 }
  0x68   : > { %2553 = vmatprep.subr.bf16.mxu0 %v2929_v6  ;;  %2630 = vmatpush3.bf16.msra.mxu1 %v2967_v34  ;;  %p3310_p13 = scmp.lt.s32.totalorder %s3308_s20, %s3302_s10 }
  0x69   : > { %2631 = vmatprep.subr.bf16.mxu1 %v2968_v37 }
  0x6a   : > { %p3311_p3 = por %p3310_p13, %p3309_p10 }
  0x6b   : > { %2554 = vmatpush3.bf16.msra.mxu0 %v2929_v6 }
  0x6c   : > { %2555 = vmatprep.subr.bf16.mxu0 %v2930_v7  ;;  %2632 = vmatpush3.bf16.msra.mxu1 %v2968_v37  ;;  %p3312_p7 = pnand %p3311_p3, %p3305_p8 }
  0x6d   : > { %2633 = vmatprep.subr.bf16.mxu1 %v2969_v38 }
  0x6f   : > { %2556 = vmatpush3.bf16.msra.mxu0 %v2930_v7 }
  0x70   : > { %2557 = vmatprep.subr.bf16.mxu0 %v2931_v8  ;;  %2634 = vmatpush3.bf16.msra.mxu1 %v2969_v38 }
  0x71   : > { %2635 = vmatprep.subr.bf16.mxu1 %v2970_v41 }
  0x73   : > { %2558 = vmatpush3.bf16.msra.mxu0 %v2931_v8 }
  0x74   : > { %2636 = vmatpush3.bf16.msra.mxu1 %v2970_v41  ;;  %2703 = vmatprep.subr.bf16.mxu0 %v2972_v48 }
  0x75   : > { %2637 = vmatprep.subr.bf16.mxu1 %v2971_v42 }
  0x76   : > { %2560 = vmatmul.mubr.bf16.vlgmr.msra.gmra.mrb[0].mxu0 %v2933_v9 }
  0x77   : > { %2563 = vmatprep.mubr.bf16.mxu0 %v2934_v10  ;;  %2704 = vmatpush3.bf16.msra.mxu0 %v2972_v48 }
  0x78   : > { %2638 = vmatpush3.bf16.msra.mxu1 %v2971_v42  ;;  %2705 = vmatprep.subr.bf16.mxu0 %v2973_v50 }
  0x7b   : > { %2706 = vmatpush3.bf16.msra.mxu0 %v2973_v50 }
  0x7c   : > { %2707 = vmatprep.subr.bf16.mxu0 %v2974_v3 }
  0x7e   : > { %2564 = vmatmul.mubr.bf16.gmra.mrb[4].mxu0 %v2935_v11  ;;  %v2976_v11 = vld [vmem:[#allocation5 + $0xa0] sm:$0xff]  }
  0x7f   : > { %2567 = vmatprep.mubr.bf16.mxu0 %v2936_v12  ;;  %2708 = vmatpush3.bf16.msra.mxu0 %v2974_v3 }
  0x80   : > { %2709 = vmatprep.subr.bf16.mxu0 %v2975_v4 }
  0x83   : > { %2710 = vmatpush3.bf16.msra.mxu0 %v2975_v4 }
  0x84   : > { %2711 = vmatprep.subr.bf16.mxu0 %v2976_v11 }
  0x86   : > { %2568 = vmatmul.mubr.bf16.gmra.mrb[8].mxu0 %v2937_v16 }
  0x87   : > { %2571 = vmatprep.mubr.bf16.mxu0 %v2938_v17  ;;  %2712 = vmatpush3.bf16.msra.mxu0 %v2976_v11 }
  0x8e   : > { %2572 = vmatmul.mubr.bf16.gmra.mrb[12].mxu0 %v2939_v18 }
  0x8f   : > { %2575 = vmatprep.mubr.bf16.mxu0 %v2940_v19 }
  0x96   : > { %2576 = vmatmul.mubr.bf16.gmra.mrb[16].mxu0 %v2941_v20  ;;  %v2977_v20 = vld [vmem:[#allocation5 + $0xa8] sm:$0xff]  }
  0x97   : > { %2579 = vmatprep.mubr.bf16.mxu0 %v2942_v21  ;;  %2713 = vmatprep.subr.bf16.mxu0 %v2977_v20 }
  0x98   : > { %2714 = vmatpush3.bf16.msra.mxu0 %v2977_v20 }
  0x9e   : > { %2580 = vmatmul.mubr.bf16.gmra.mrb[20].mxu0 %v2943_v22 }
  0x9f   : > { %2583 = vmatprep.mubr.bf16.mxu0 %v2944_v23 }
  0xa6   : > { %2584 = vmatmul.mubr.bf16.gmra.mrb[24].mxu0 %v2945_v24 }
  0xa7   : > { %2587 = vmatprep.mubr.bf16.mxu0 %v2946_v25 }
  0xae   : > { %2588 = vmatmul.mubr.bf16.gmra.mrb[28].mxu0 %v2947_v26 }
  0xaf   : > { %2591 = vmatprep.mubr.bf16.mxu0 %v2948_v27  ;;  %v2978_v27 = vld [vmem:[#allocation5 + $0xb0] sm:$0xff]  }
  0xb0   : > { %2715 = vmatprep.subr.bf16.mxu0 %v2978_v27 }
  0xb1   : > { %2716 = vmatpush3.bf16.msra.mxu0 %v2978_v27 }
  0xb6   : > { %2592 = vmatmul.mubr.bf16.gmra.mrb[32].mxu0 %v2949_v28 }
  0xb7   : > { %2595 = vmatprep.mubr.bf16.mxu0 %v2950_v29 }
  0xbe   : > { %2596 = vmatmul.mubr.bf16.gmra.mrb[36].mxu0 %v2951_v30 }
  0xbf   : > { %2599 = vmatprep.mubr.bf16.mxu0 %v2952_v31 }
  0xc6   : > { %2600 = vmatmul.mubr.bf16.gmra.mrb[40].mxu0 %v2953_v32 }
  0xc7   : > { %2603 = vmatprep.mubr.bf16.mxu0 %v2954_v33 }
  0xce   : > { %2604 = vmatmul.mubr.bf16.gmra.mrb[44].mxu0 %v2955_v35 }
  0xcf   : > { %2607 = vmatprep.mubr.bf16.mxu0 %v2956_v36  ;;  %v2979_v36 = vld [vmem:[#allocation5 + $0xb8] sm:$0xff]  }
  0xd0   : > { %2717 = vmatprep.subr.bf16.mxu0 %v2979_v36 }
  0xd1   : > { %2718 = vmatpush3.bf16.msra.mxu0 %v2979_v36 }
  0xd6   : > { %2608 = vmatmul.mubr.bf16.gmra.mrb[48].mxu0 %v2957_v39 }
  0xd7   : > { %2611 = vmatprep.mubr.bf16.mxu0 %v2958_v40 }
  0xde   : > { %2612 = vmatmul.mubr.bf16.gmra.mrb[52].mxu0 %v2959_v43 }
  0xdf   : > { %2615 = vmatprep.mubr.bf16.mxu0 %v2960_v44 }
  0xe6   : > { %2616 = vmatmul.mubr.bf16.gmra.mrb[56].mxu0 %v2961_v45 }
  0xe7   : > { %2619 = vmatprep.mubr.bf16.mxu0 %v2962_v46 }
  0xee   : > { %2620 = vmatmul.mubr.bf16.gmra.mrb[60].mxu0 %v2963_v47 }
 0x149   : > { %v2561_v51 = vpop.f32.mrb[0].mxu0 }
 0x14a   : > { %v577_v52 = vadd.f32 %v2561_v51, %v3595_v49  ;;  %v568_v53 = vpop.f32.mrb[1].mxu0 }
 0x14b   : > { %v569_v54 = vadd.f32 %v3595_v49, %v568_v53  ;;  %v2562_v55 = vpop.f32.mrb[2].mxu0 }
 0x14c   : > { %2988 = vtanh.f32 %v577_v52  ;;  %v580_v56 = vadd.f32 %v2562_v55, %v3595_v49  ;;  %v571_v57 = vpop.f32.mrb[3].mxu0 }
 0x14d   : > { %2990 = vtanh.f32 %v569_v54  ;;  %v572_v58 = vadd.f32 %v3595_v49, %v571_v57 }
 0x14e   : > { %2992 = vtanh.f32 %v580_v56 }
 0x14f   : > { %2994 = vtanh.f32 %v572_v58 }
 0x151   : > { %v2565_v59 = vpop.f32.mrb[4].mxu0 }
 0x152   : > { %v593_v60 = vadd.f32 %v2565_v59, %v3595_v49  ;;  %v584_v61 = vpop.f32.mrb[5].mxu0 }
 0x153   : > { %v585_v62 = vadd.f32 %v3595_v49, %v584_v61  ;;  %v2566_v63 = vpop.f32.mrb[6].mxu0 }
 0x154   : > { %2996 = vtanh.f32 %v593_v60  ;;  %v596_v0 = vadd.f32 %v2566_v63, %v3595_v49  ;;  %v587_v1 = vpop.f32.mrb[7].mxu0 }
 0x155   : > { %2998 = vtanh.f32 %v585_v62  ;;  %v588_v2 = vadd.f32 %v3595_v49, %v587_v1 }
 0x156   : > { %v2989_v5 = vpop.eup %2988  ;;  %3000 = vtanh.f32 %v596_v0 }
 0x157   : > { %v2991_v6 = vpop.eup %2990  ;;  %3002 = vtanh.f32 %v588_v2 }
 0x158   : > { %v2993_v7 = vpop.eup %2992 }
 0x159   : > { %v2995_v8 = vpop.eup %2994  ;;  %v2569_v9 = vpop.f32.mrb[8].mxu0  ;;  %v888_v10 = vpack.c.bf16 %v2993_v7, %v2989_v5 }
 0x15a   : > { %v609_v12 = vadd.f32 %v2569_v9, %v3595_v49  ;;  %v600_v13 = vpop.f32.mrb[9].mxu0  ;;  %v887_v14 = vpack.c.bf16 %v2995_v8, %v2991_v6 }
 0x15b   : > { %v601_v15 = vadd.f32 %v3595_v49, %v600_v13  ;;  %v2570_v16 = vpop.f32.mrb[10].mxu0 }
 0x15c   : > { %3004 = vtanh.f32 %v609_v12  ;;  %v612_v17 = vadd.f32 %v2570_v16, %v3595_v49  ;;  %v603_v18 = vpop.f32.mrb[11].mxu0  ;;  %2639 = vmatprep.mubr.bf16.mxu1 %v887_v14 }
 0x15d   : > { %3006 = vtanh.f32 %v601_v15  ;;  %v604_v19 = vadd.f32 %v3595_v49, %v603_v18  ;;  %2640 = vmatmul.mubr.bf16.vlgmr.msra.gmra.mrb[0].mxu1 %v888_v10 }
 0x15e   : > { %v2997_v21 = vpop.eup %2996  ;;  %3008 = vtanh.f32 %v612_v17 }
 0x15f   : > { %v2999_v22 = vpop.eup %2998  ;;  %3010 = vtanh.f32 %v604_v19 }
 0x160   : > { %v3001_v23 = vpop.eup %3000 }
 0x161   : > { %v3003_v24 = vpop.eup %3002  ;;  %v2573_v25 = vpop.f32.mrb[12].mxu0  ;;  %v890_v26 = vpack.c.bf16 %v3001_v23, %v2997_v21 }
 0x162   : > { %v625_v28 = vadd.f32 %v2573_v25, %v3595_v49  ;;  %v616_v29 = vpop.f32.mrb[13].mxu0  ;;  %v889_v30 = vpack.c.bf16 %v3003_v24, %v2999_v22 }
 0x163   : > { %v617_v31 = vadd.f32 %v3595_v49, %v616_v29  ;;  %v2574_v32 = vpop.f32.mrb[14].mxu0 }
 0x164   : > { %3012 = vtanh.f32 %v625_v28  ;;  %v628_v33 = vadd.f32 %v2574_v32, %v3595_v49  ;;  %v619_v34 = vpop.f32.mrb[15].mxu0  ;;  %2643 = vmatprep.mubr.bf16.mxu1 %v889_v30 }
 0x165   : > { %3014 = vtanh.f32 %v617_v31  ;;  %v620_v35 = vadd.f32 %v3595_v49, %v619_v34  ;;  %2644 = vmatmul.mubr.bf16.gmra.mrb[4].mxu1 %v890_v26 }
 0x166   : > { %v3005_v37 = vpop.eup %3004  ;;  %3016 = vtanh.f32 %v628_v33 }
 0x167   : > { %v3007_v38 = vpop.eup %3006  ;;  %3018 = vtanh.f32 %v620_v35 }
 0x168   : > { %v3009_v39 = vpop.eup %3008 }
 0x169   : > { %v3011_v40 = vpop.eup %3010  ;;  %v2577_v41 = vpop.f32.mrb[16].mxu0  ;;  %v892_v42 = vpack.c.bf16 %v3009_v39, %v3005_v37 }
 0x16a   : > { %v641_v43 = vadd.f32 %v2577_v41, %v3595_v49  ;;  %v632_v44 = vpop.f32.mrb[17].mxu0  ;;  %v891_v45 = vpack.c.bf16 %v3011_v40, %v3007_v38 }
 0x16b   : > { %v633_v46 = vadd.f32 %v3595_v49, %v632_v44  ;;  %v2578_v47 = vpop.f32.mrb[18].mxu0 }
 0x16c   : > { %3020 = vtanh.f32 %v641_v43  ;;  %v644_v48 = vadd.f32 %v2578_v47, %v3595_v49  ;;  %v635_v50 = vpop.f32.mrb[19].mxu0  ;;  %2647 = vmatprep.mubr.bf16.mxu1 %v891_v45 }
 0x16d   : > { %3022 = vtanh.f32 %v633_v46  ;;  %v636_v51 = vadd.f32 %v3595_v49, %v635_v50  ;;  %2648 = vmatmul.mubr.bf16.gmra.mrb[8].mxu1 %v892_v42 }
 0x16e   : > { %v3013_v52 = vpop.eup %3012  ;;  %3024 = vtanh.f32 %v644_v48 }
 0x16f   : > { %v3015_v53 = vpop.eup %3014  ;;  %3026 = vtanh.f32 %v636_v51 }
 0x170   : > { %v3017_v54 = vpop.eup %3016 }
 0x171   : > { %v3019_v55 = vpop.eup %3018  ;;  %v2581_v56 = vpop.f32.mrb[20].mxu0  ;;  %v894_v57 = vpack.c.bf16 %v3017_v54, %v3013_v52 }
 0x172   : > { %v657_v58 = vadd.f32 %v2581_v56, %v3595_v49  ;;  %v648_v59 = vpop.f32.mrb[21].mxu0  ;;  %v893_v60 = vpack.c.bf16 %v3019_v55, %v3015_v53 }
 0x173   : > { %v649_v61 = vadd.f32 %v3595_v49, %v648_v59  ;;  %v2582_v62 = vpop.f32.mrb[22].mxu0 }
 0x174   : > { %3028 = vtanh.f32 %v657_v58  ;;  %v660_v63 = vadd.f32 %v2582_v62, %v3595_v49  ;;  %v651_v0 = vpop.f32.mrb[23].mxu0  ;;  %2651 = vmatprep.mubr.bf16.mxu1 %v893_v60 }
 0x175   : > { %3030 = vtanh.f32 %v649_v61  ;;  %v652_v1 = vadd.f32 %v3595_v49, %v651_v0  ;;  %2652 = vmatmul.mubr.bf16.gmra.mrb[12].mxu1 %v894_v57 }
 0x176   : > { %v3021_v2 = vpop.eup %3020  ;;  %3032 = vtanh.f32 %v660_v63 }
 0x177   : > { %v3023_v3 = vpop.eup %3022  ;;  %3034 = vtanh.f32 %v652_v1 }
 0x178   : > { %v3025_v4 = vpop.eup %3024 }
 0x179   : > { %v3027_v5 = vpop.eup %3026  ;;  %v2585_v6 = vpop.f32.mrb[24].mxu0  ;;  %v896_v7 = vpack.c.bf16 %v3025_v4, %v3021_v2 }
 0x17a   : > { %v673_v8 = vadd.f32 %v2585_v6, %v3595_v49  ;;  %v664_v9 = vpop.f32.mrb[25].mxu0  ;;  %v895_v10 = vpack.c.bf16 %v3027_v5, %v3023_v3 }
 0x17b   : > { %v665_v11 = vadd.f32 %v3595_v49, %v664_v9  ;;  %v2586_v12 = vpop.f32.mrb[26].mxu0 }
 0x17c   : > { %3036 = vtanh.f32 %v673_v8  ;;  %v676_v13 = vadd.f32 %v2586_v12, %v3595_v49  ;;  %v667_v14 = vpop.f32.mrb[27].mxu0  ;;  %2655 = vmatprep.mubr.bf16.mxu1 %v895_v10 }
 0x17d   : > { %3038 = vtanh.f32 %v665_v11  ;;  %v668_v15 = vadd.f32 %v3595_v49, %v667_v14  ;;  %2656 = vmatmul.mubr.bf16.gmra.mrb[16].mxu1 %v896_v7 }
 0x17e   : > { %v3029_v16 = vpop.eup %3028  ;;  %3040 = vtanh.f32 %v676_v13 }
 0x17f   : > { %v3031_v17 = vpop.eup %3030  ;;  %3042 = vtanh.f32 %v668_v15 }
 0x180   : > { %v3033_v18 = vpop.eup %3032 }
 0x181   : > { %v3035_v19 = vpop.eup %3034  ;;  %v2589_v20 = vpop.f32.mrb[28].mxu0  ;;  %v898_v21 = vpack.c.bf16 %v3033_v18, %v3029_v16 }
 0x182   : > { %v689_v22 = vadd.f32 %v2589_v20, %v3595_v49  ;;  %v680_v23 = vpop.f32.mrb[29].mxu0  ;;  %v897_v24 = vpack.c.bf16 %v3035_v19, %v3031_v17 }
 0x183   : > { %v681_v25 = vadd.f32 %v3595_v49, %v680_v23  ;;  %v2590_v26 = vpop.f32.mrb[30].mxu0 }
 0x184   : > { %3044 = vtanh.f32 %v689_v22  ;;  %v692_v27 = vadd.f32 %v2590_v26, %v3595_v49  ;;  %v683_v28 = vpop.f32.mrb[31].mxu0  ;;  %2659 = vmatprep.mubr.bf16.mxu1 %v897_v24 }
 0x185   : > { %3046 = vtanh.f32 %v681_v25  ;;  %v684_v29 = vadd.f32 %v3595_v49, %v683_v28  ;;  %2660 = vmatmul.mubr.bf16.gmra.mrb[20].mxu1 %v898_v21 }
 0x186   : > { %v3037_v30 = vpop.eup %3036  ;;  %3048 = vtanh.f32 %v692_v27 }
 0x187   : > { %v3039_v31 = vpop.eup %3038  ;;  %3050 = vtanh.f32 %v684_v29 }
 0x188   : > { %v3041_v32 = vpop.eup %3040 }
 0x189   : > { %v3043_v33 = vpop.eup %3042  ;;  %v2593_v34 = vpop.f32.mrb[32].mxu0  ;;  %v900_v35 = vpack.c.bf16 %v3041_v32, %v3037_v30 }
 0x18a   : > { %v705_v36 = vadd.f32 %v2593_v34, %v3595_v49  ;;  %v696_v37 = vpop.f32.mrb[33].mxu0  ;;  %v899_v38 = vpack.c.bf16 %v3043_v33, %v3039_v31 }
 0x18b   : > { %v697_v39 = vadd.f32 %v3595_v49, %v696_v37  ;;  %v2594_v40 = vpop.f32.mrb[34].mxu0 }
 0x18c   : > { %3052 = vtanh.f32 %v705_v36  ;;  %v708_v41 = vadd.f32 %v2594_v40, %v3595_v49  ;;  %v699_v42 = vpop.f32.mrb[35].mxu0  ;;  %2663 = vmatprep.mubr.bf16.mxu1 %v899_v38 }
 0x18d   : > { %3054 = vtanh.f32 %v697_v39  ;;  %v700_v43 = vadd.f32 %v3595_v49, %v699_v42  ;;  %2664 = vmatmul.mubr.bf16.gmra.mrb[24].mxu1 %v900_v35 }
 0x18e   : > { %v3045_v44 = vpop.eup %3044  ;;  %3056 = vtanh.f32 %v708_v41 }
 0x18f   : > { %v3047_v45 = vpop.eup %3046  ;;  %3058 = vtanh.f32 %v700_v43 }
 0x190   : > { %v3049_v46 = vpop.eup %3048 }
 0x191   : > { %v3051_v47 = vpop.eup %3050  ;;  %v2597_v48 = vpop.f32.mrb[36].mxu0  ;;  %v902_v50 = vpack.c.bf16 %v3049_v46, %v3045_v44 }
 0x192   : > { %v721_v51 = vadd.f32 %v2597_v48, %v3595_v49  ;;  %v712_v52 = vpop.f32.mrb[37].mxu0  ;;  %v901_v53 = vpack.c.bf16 %v3051_v47, %v3047_v45 }
 0x193   : > { %v713_v54 = vadd.f32 %v3595_v49, %v712_v52  ;;  %v2598_v55 = vpop.f32.mrb[38].mxu0 }
 0x194   : > { %3060 = vtanh.f32 %v721_v51  ;;  %v724_v56 = vadd.f32 %v2598_v55, %v3595_v49  ;;  %v715_v57 = vpop.f32.mrb[39].mxu0  ;;  %2667 = vmatprep.mubr.bf16.mxu1 %v901_v53 }
 0x195   : > { %3062 = vtanh.f32 %v713_v54  ;;  %v716_v58 = vadd.f32 %v3595_v49, %v715_v57  ;;  %2668 = vmatmul.mubr.bf16.gmra.mrb[28].mxu1 %v902_v50 }
 0x196   : > { %v3053_v59 = vpop.eup %3052  ;;  %3064 = vtanh.f32 %v724_v56 }
 0x197   : > { %v3055_v60 = vpop.eup %3054  ;;  %3066 = vtanh.f32 %v716_v58 }
 0x198   : > { %v3057_v61 = vpop.eup %3056 }
 0x199   : > { %v3059_v62 = vpop.eup %3058  ;;  %v2601_v63 = vpop.f32.mrb[40].mxu0  ;;  %v904_v0 = vpack.c.bf16 %v3057_v61, %v3053_v59 }
 0x19a   : > { %v737_v1 = vadd.f32 %v2601_v63, %v3595_v49  ;;  %v728_v2 = vpop.f32.mrb[41].mxu0  ;;  %v903_v3 = vpack.c.bf16 %v3059_v62, %v3055_v60 }
 0x19b   : > { %v729_v4 = vadd.f32 %v3595_v49, %v728_v2  ;;  %v2602_v5 = vpop.f32.mrb[42].mxu0 }
 0x19c   : > { %3068 = vtanh.f32 %v737_v1  ;;  %v740_v6 = vadd.f32 %v2602_v5, %v3595_v49  ;;  %v731_v7 = vpop.f32.mrb[43].mxu0  ;;  %2671 = vmatprep.mubr.bf16.mxu1 %v903_v3 }
 0x19d   : > { %3070 = vtanh.f32 %v729_v4  ;;  %v732_v8 = vadd.f32 %v3595_v49, %v731_v7  ;;  %2672 = vmatmul.mubr.bf16.gmra.mrb[32].mxu1 %v904_v0 }
 0x19e   : > { %v3061_v9 = vpop.eup %3060  ;;  %3072 = vtanh.f32 %v740_v6 }
 0x19f   : > { %v3063_v10 = vpop.eup %3062  ;;  %3074 = vtanh.f32 %v732_v8 }
 0x1a0   : > { %v3065_v11 = vpop.eup %3064 }
 0x1a1   : > { %v3067_v12 = vpop.eup %3066  ;;  %v2605_v13 = vpop.f32.mrb[44].mxu0  ;;  %v906_v14 = vpack.c.bf16 %v3065_v11, %v3061_v9 }
 0x1a2   : > { %v753_v15 = vadd.f32 %v2605_v13, %v3595_v49  ;;  %v744_v16 = vpop.f32.mrb[45].mxu0  ;;  %v905_v17 = vpack.c.bf16 %v3067_v12, %v3063_v10 }
 0x1a3   : > { %v745_v18 = vadd.f32 %v3595_v49, %v744_v16  ;;  %v2606_v19 = vpop.f32.mrb[46].mxu0 }
 0x1a4   : > { %3076 = vtanh.f32 %v753_v15  ;;  %v756_v20 = vadd.f32 %v2606_v19, %v3595_v49  ;;  %v747_v21 = vpop.f32.mrb[47].mxu0  ;;  %2675 = vmatprep.mubr.bf16.mxu1 %v905_v17 }
 0x1a5   : > { %3078 = vtanh.f32 %v745_v18  ;;  %v748_v22 = vadd.f32 %v3595_v49, %v747_v21  ;;  %2676 = vmatmul.mubr.bf16.gmra.mrb[36].mxu1 %v906_v14 }
 0x1a6   : > { %v3069_v23 = vpop.eup %3068  ;;  %3080 = vtanh.f32 %v756_v20 }
 0x1a7   : > { %v3071_v24 = vpop.eup %3070  ;;  %3082 = vtanh.f32 %v748_v22 }
 0x1a8   : > { %v3073_v25 = vpop.eup %3072 }
 0x1a9   : > { %v3075_v26 = vpop.eup %3074  ;;  %v2609_v27 = vpop.f32.mrb[48].mxu0  ;;  %v908_v28 = vpack.c.bf16 %v3073_v25, %v3069_v23 }
 0x1aa   : > { %v769_v29 = vadd.f32 %v2609_v27, %v3595_v49  ;;  %v760_v30 = vpop.f32.mrb[49].mxu0  ;;  %v907_v31 = vpack.c.bf16 %v3075_v26, %v3071_v24 }
 0x1ab   : > { %v761_v32 = vadd.f32 %v3595_v49, %v760_v30  ;;  %v2610_v33 = vpop.f32.mrb[50].mxu0  ;;  %v3664_v30 = vld [vmem:[%s3988_s2 + $0x1] ss:$0 sm:$0xff] }
 0x1ac   : > { %3084 = vtanh.f32 %v769_v29  ;;  %v772_v34 = vadd.f32 %v2610_v33, %v3595_v49  ;;  %v763_v35 = vpop.f32.mrb[51].mxu0  ;;  %2679 = vmatprep.mubr.bf16.mxu1 %v907_v31 }
 0x1ad   : > { %3086 = vtanh.f32 %v761_v32  ;;  %v764_v36 = vadd.f32 %v3595_v49, %v763_v35  ;;  %2680 = vmatmul.mubr.bf16.gmra.mrb[40].mxu1 %v908_v28  ;;  %v2981_v28 = vld [vmem:[#allocation5 + $0xc8] sm:$0xff]   ;;  %v2982_v32 = vld [vmem:[#allocation5 + $0xd0] sm:$0xff]  }
 0x1ae   : > { %v3077_v37 = vpop.eup %3076  ;;  %3088 = vtanh.f32 %v772_v34  ;;  %v2983_v34 = vld [vmem:[#allocation5 + $0xd8] sm:$0xff]  }
 0x1af   : > { %v3079_v38 = vpop.eup %3078  ;;  %3090 = vtanh.f32 %v764_v36 }
 0x1b0   : > { %v3081_v39 = vpop.eup %3080 }
 0x1b1   : > { %v3083_v40 = vpop.eup %3082  ;;  %v2613_v41 = vpop.f32.mrb[52].mxu0  ;;  %v910_v42 = vpack.c.bf16 %v3081_v39, %v3077_v37 }
 0x1b2   : > { %v785_v43 = vadd.f32 %v2613_v41, %v3595_v49  ;;  %v776_v44 = vpop.f32.mrb[53].mxu0  ;;  %v909_v45 = vpack.c.bf16 %v3083_v40, %v3079_v38 }
 0x1b3   : > { %v777_v46 = vadd.f32 %v3595_v49, %v776_v44  ;;  %v2614_v47 = vpop.f32.mrb[54].mxu0 }
 0x1b4   : > { %3092 = vtanh.f32 %v785_v43  ;;  %v788_v48 = vadd.f32 %v2614_v47, %v3595_v49  ;;  %v779_v50 = vpop.f32.mrb[55].mxu0  ;;  %2683 = vmatprep.mubr.bf16.mxu1 %v909_v45 }
 0x1b5   : > { %3094 = vtanh.f32 %v777_v46  ;;  %v780_v51 = vadd.f32 %v3595_v49, %v779_v50  ;;  %2684 = vmatmul.mubr.bf16.gmra.mrb[44].mxu1 %v910_v42  ;;  %v2984_v42 = vld [vmem:[#allocation5 + $0xe0] sm:$0xff]   ;;  %v2985_v46 = vld [vmem:[#allocation5 + $0xe8] sm:$0xff]  }
 0x1b6   : > { %v3085_v52 = vpop.eup %3084  ;;  %3096 = vtanh.f32 %v788_v48 }
 0x1b7   : > { %v3087_v53 = vpop.eup %3086  ;;  %3098 = vtanh.f32 %v780_v51 }
 0x1b8   : > { %v3089_v54 = vpop.eup %3088 }
 0x1b9   : > { %v3091_v55 = vpop.eup %3090  ;;  %v2617_v56 = vpop.f32.mrb[56].mxu0  ;;  %v912_v57 = vpack.c.bf16 %v3089_v54, %v3085_v52 }
 0x1ba   : > { %v801_v58 = vadd.f32 %v2617_v56, %v3595_v49  ;;  %v792_v59 = vpop.f32.mrb[57].mxu0  ;;  %v911_v60 = vpack.c.bf16 %v3091_v55, %v3087_v53  ;;  %v2986_v55 = vld [vmem:[#allocation5 + $0xf0] sm:$0xff]  }
 0x1bb   : > { %v793_v61 = vadd.f32 %v3595_v49, %v792_v59  ;;  %v2618_v62 = vpop.f32.mrb[58].mxu0 }
 0x1bc   : > { %3100 = vtanh.f32 %v801_v58  ;;  %v804_v63 = vadd.f32 %v2618_v62, %v3595_v49  ;;  %v795_v0 = vpop.f32.mrb[59].mxu0  ;;  %2687 = vmatprep.mubr.bf16.mxu1 %v911_v60 }
 0x1bd   : > { %3102 = vtanh.f32 %v793_v61  ;;  %v796_v1 = vadd.f32 %v3595_v49, %v795_v0  ;;  %2688 = vmatmul.mubr.bf16.gmra.mrb[48].mxu1 %v912_v57 }
 0x1be   : > { %v3093_v2 = vpop.eup %3092  ;;  %3104 = vtanh.f32 %v804_v63 }
 0x1bf   : > { %v3095_v3 = vpop.eup %3094  ;;  %3106 = vtanh.f32 %v796_v1 }
 0x1c0   : > { %v3097_v4 = vpop.eup %3096 }
 0x1c1   : > { %v3099_v5 = vpop.eup %3098  ;;  %v2621_v6 = vpop.f32.mrb[60].mxu0  ;;  %v914_v7 = vpack.c.bf16 %v3097_v4, %v3093_v2 }
 0x1c2   : > { %v817_v8 = vadd.f32 %v2621_v6, %v3595_v49  ;;  %v808_v9 = vpop.f32.mrb[61].mxu0  ;;  %v913_v10 = vpack.c.bf16 %v3099_v5, %v3095_v3 }
 0x1c3   : > { %v809_v11 = vadd.f32 %v3595_v49, %v808_v9  ;;  %v2622_v12 = vpop.f32.mrb[62].mxu0 }
 0x1c4   : > { %3108 = vtanh.f32 %v817_v8  ;;  %v820_v13 = vadd.f32 %v2622_v12, %v3595_v49  ;;  %v811_v14 = vpop.f32.mrb[63].mxu0  ;;  %2691 = vmatprep.mubr.bf16.mxu1 %v913_v10 }
 0x1c5   : > { %3110 = vtanh.f32 %v809_v11  ;;  %v812_v15 = vadd.f32 %v3595_v49, %v811_v14  ;;  %2692 = vmatmul.mubr.bf16.gmra.mrb[52].mxu1 %v914_v7  ;;  %v2980_v49 = vld [vmem:[#allocation5 + $0xc0] sm:$0xff]  }
 0x1c6   : > { %v3101_v16 = vpop.eup %3100  ;;  %3112 = vtanh.f32 %v820_v13  ;;  %2783 = vmatprep.subr.bf16.mxu1 %v2980_v49 }
 0x1c7   : > { %v3103_v17 = vpop.eup %3102  ;;  %3114 = vtanh.f32 %v812_v15  ;;  %2784 = vmatpush3.bf16.msra.mxu1 %v2980_v49 }
 0x1c8   : > { %v3105_v18 = vpop.eup %3104  ;;  %2785 = vmatprep.subr.bf16.mxu1 %v2981_v28 }
 0x1c9   : > { %v3107_v19 = vpop.eup %3106  ;;  %v916_v20 = vpack.c.bf16 %v3105_v18, %v3101_v16 }
 0x1ca   : > { %v915_v21 = vpack.c.bf16 %v3107_v19, %v3103_v17 }
 0x1cb   : > { %2786 = vmatpush3.bf16.msra.mxu1 %v2981_v28 }
 0x1cc   : > { %2695 = vmatprep.mubr.bf16.mxu1 %v915_v21  ;;  %2787 = vmatprep.subr.bf16.mxu1 %v2982_v32 }
 0x1cd   : > { %2696 = vmatmul.mubr.bf16.gmra.mrb[56].mxu1 %v916_v20 }
 0x1ce   : > { %v3109_v22 = vpop.eup %3108 }
 0x1cf   : > { %v3111_v23 = vpop.eup %3110  ;;  %2788 = vmatpush3.bf16.msra.mxu1 %v2982_v32 }
 0x1d0   : > { %v3113_v24 = vpop.eup %3112  ;;  %2789 = vmatprep.subr.bf16.mxu1 %v2983_v34 }
 0x1d1   : > { %v3115_v25 = vpop.eup %3114  ;;  %v918_v26 = vpack.c.bf16 %v3113_v24, %v3109_v22 }
 0x1d2   : > { %v917_v27 = vpack.c.bf16 %v3115_v25, %v3111_v23 }
 0x1d3   : > { %2790 = vmatpush3.bf16.msra.mxu1 %v2983_v34 }
 0x1d4   : > { %2699 = vmatprep.mubr.bf16.mxu1 %v917_v27  ;;  %2791 = vmatprep.subr.bf16.mxu1 %v2984_v42 }
 0x1d5   : > { %2700 = vmatmul.mubr.bf16.gmra.mrb[60].mxu1 %v918_v26 }
 0x1d7   : > { %2792 = vmatpush3.bf16.msra.mxu1 %v2984_v42 }
 0x1d8   : > { %2793 = vmatprep.subr.bf16.mxu1 %v2985_v46 }
 0x1db   : > { %2794 = vmatpush3.bf16.msra.mxu1 %v2985_v46 }
 0x1dc   : > { %2795 = vmatprep.subr.bf16.mxu1 %v2986_v55 }
 0x1df   : > { %2796 = vmatpush3.bf16.msra.mxu1 %v2986_v55 }
 0x230   : > { %v2641_v29 = vpop.f32.mrb[0].mxu1 }
 0x231   : > { %v1026_v31 = vpop.f32.mrb[1].mxu1  ;;  %v1035_v35 = vadd.f32 %v2641_v29, %v3664_v30 }
 0x232   : > { %v2642_v33 = vpop.f32.mrb[2].mxu1  ;;  %v1027_v38 = vadd.f32 %v3664_v30, %v1026_v31 }
 0x233   : > { %v1038_v36 = vadd.f32 %v2642_v33, %v3664_v30  ;;  %v1029_v37 = vpop.f32.mrb[3].mxu1 }
 0x234   : > { %v1030_v39 = vadd.f32 %v3664_v30, %v1029_v37 }
 0x235   : > { %v1282_v40 = vpack.c.bf16 %v1038_v36, %v1035_v35 }
 0x236   : > { %v1281_v41 = vpack.c.bf16 %v1030_v39, %v1027_v38 }
 0x238   : > { %v2645_v43 = vpop.f32.mrb[4].mxu1  ;;  %2719 = vmatprep.mubr.bf16.mxu0 %v1281_v41 }
 0x239   : > { %v1042_v44 = vpop.f32.mrb[5].mxu1  ;;  %2720 = vmatmul.mubr.bf16.vlgmr.msra.gmra.mrb[64].mxu0 %v1282_v40  ;;  %v1051_v47 = vadd.f32 %v2645_v43, %v3664_v30 }
 0x23a   : > { %v2646_v45 = vpop.f32.mrb[6].mxu1  ;;  %v1043_v51 = vadd.f32 %v3664_v30, %v1042_v44 }
 0x23b   : > { %v1054_v48 = vadd.f32 %v2646_v45, %v3664_v30  ;;  %v1045_v50 = vpop.f32.mrb[7].mxu1 }
 0x23c   : > { %v1046_v52 = vadd.f32 %v3664_v30, %v1045_v50 }
 0x23d   : > { %v1284_v53 = vpack.c.bf16 %v1054_v48, %v1051_v47 }
 0x23e   : > { %v1283_v54 = vpack.c.bf16 %v1046_v52, %v1043_v51 }
 0x240   : > { %v2649_v56 = vpop.f32.mrb[8].mxu1  ;;  %2723 = vmatprep.mubr.bf16.mxu0 %v1283_v54 }
 0x241   : > { %v1058_v57 = vpop.f32.mrb[9].mxu1  ;;  %2724 = vmatmul.mubr.bf16.gmra.mrb[68].mxu0 %v1284_v53  ;;  %v1067_v59 = vadd.f32 %v2649_v56, %v3664_v30 }
 0x242   : > { %v2650_v58 = vpop.f32.mrb[10].mxu1  ;;  %v1059_v62 = vadd.f32 %v3664_v30, %v1058_v57 }
 0x243   : > { %v1070_v60 = vadd.f32 %v2650_v58, %v3664_v30  ;;  %v1061_v61 = vpop.f32.mrb[11].mxu1 }
 0x244   : > { %v1062_v63 = vadd.f32 %v3664_v30, %v1061_v61 }
 0x245   : > { %v1286_v0 = vpack.c.bf16 %v1070_v60, %v1067_v59 }
 0x246   : > { %v1285_v1 = vpack.c.bf16 %v1062_v63, %v1059_v62 }
 0x248   : > { %v2653_v2 = vpop.f32.mrb[12].mxu1  ;;  %2727 = vmatprep.mubr.bf16.mxu0 %v1285_v1 }
 0x249   : > { %v1074_v3 = vpop.f32.mrb[13].mxu1  ;;  %2728 = vmatmul.mubr.bf16.gmra.mrb[72].mxu0 %v1286_v0  ;;  %v1083_v5 = vadd.f32 %v2653_v2, %v3664_v30 }
 0x24a   : > { %v2654_v4 = vpop.f32.mrb[14].mxu1  ;;  %v1075_v8 = vadd.f32 %v3664_v30, %v1074_v3 }
 0x24b   : > { %v1086_v6 = vadd.f32 %v2654_v4, %v3664_v30  ;;  %v1077_v7 = vpop.f32.mrb[15].mxu1 }
 0x24c   : > { %v1078_v9 = vadd.f32 %v3664_v30, %v1077_v7 }
 0x24d   : > { %v1288_v10 = vpack.c.bf16 %v1086_v6, %v1083_v5 }
 0x24e   : > { %v1287_v11 = vpack.c.bf16 %v1078_v9, %v1075_v8 }
 0x250   : > { %v2657_v12 = vpop.f32.mrb[16].mxu1  ;;  %2731 = vmatprep.mubr.bf16.mxu0 %v1287_v11 }
 0x251   : > { %v1090_v13 = vpop.f32.mrb[17].mxu1  ;;  %2732 = vmatmul.mubr.bf16.gmra.mrb[76].mxu0 %v1288_v10  ;;  %v1099_v15 = vadd.f32 %v2657_v12, %v3664_v30 }
 0x252   : > { %v2658_v14 = vpop.f32.mrb[18].mxu1  ;;  %v1091_v18 = vadd.f32 %v3664_v30, %v1090_v13 }
 0x253   : > { %v1102_v16 = vadd.f32 %v2658_v14, %v3664_v30  ;;  %v1093_v17 = vpop.f32.mrb[19].mxu1 }
 0x254   : > { %v1094_v19 = vadd.f32 %v3664_v30, %v1093_v17 }
 0x255   : > { %v1290_v20 = vpack.c.bf16 %v1102_v16, %v1099_v15 }
 0x256   : > { %v1289_v21 = vpack.c.bf16 %v1094_v19, %v1091_v18 }
 0x258   : > { %v2661_v22 = vpop.f32.mrb[20].mxu1  ;;  %2735 = vmatprep.mubr.bf16.mxu0 %v1289_v21 }
 0x259   : > { %v1106_v23 = vpop.f32.mrb[21].mxu1  ;;  %2736 = vmatmul.mubr.bf16.gmra.mrb[80].mxu0 %v1290_v20  ;;  %v1115_v25 = vadd.f32 %v2661_v22, %v3664_v30 }
 0x25a   : > { %v2662_v24 = vpop.f32.mrb[22].mxu1  ;;  %v1107_v49 = vadd.f32 %v3664_v30, %v1106_v23 }
 0x25b   : > { %v1118_v26 = vadd.f32 %v2662_v24, %v3664_v30  ;;  %v1109_v27 = vpop.f32.mrb[23].mxu1 }
 0x25c   : > { %v1110_v28 = vadd.f32 %v3664_v30, %v1109_v27 }
 0x25d   : > { %v1292_v29 = vpack.c.bf16 %v1118_v26, %v1115_v25 }
 0x25e   : > { %v1291_v31 = vpack.c.bf16 %v1110_v28, %v1107_v49 }
 0x260   : > { %v2665_v32 = vpop.f32.mrb[24].mxu1  ;;  %2739 = vmatprep.mubr.bf16.mxu0 %v1291_v31 }
 0x261   : > { %v1122_v33 = vpop.f32.mrb[25].mxu1  ;;  %2740 = vmatmul.mubr.bf16.gmra.mrb[84].mxu0 %v1292_v29  ;;  %v1131_v35 = vadd.f32 %v2665_v32, %v3664_v30  ;;  %v2987_v32 = vld [vmem:[#allocation5 + $0xf8] sm:$0xff]  }
 0x262   : > { %v2666_v34 = vpop.f32.mrb[26].mxu1  ;;  %v1123_v38 = vadd.f32 %v3664_v30, %v1122_v33  ;;  %2797 = vmatprep.subr.bf16.mxu1 %v2987_v32 }
 0x263   : > { %v1134_v36 = vadd.f32 %v2666_v34, %v3664_v30  ;;  %v1125_v37 = vpop.f32.mrb[27].mxu1  ;;  %2798 = vmatpush3.bf16.msra.mxu1 %v2987_v32 }
 0x264   : > { %v1126_v39 = vadd.f32 %v3664_v30, %v1125_v37 }
 0x265   : > { %v1294_v40 = vpack.c.bf16 %v1134_v36, %v1131_v35 }
 0x266   : > { %v1293_v41 = vpack.c.bf16 %v1126_v39, %v1123_v38 }
 0x268   : > { %v2669_v42 = vpop.f32.mrb[28].mxu1  ;;  %2743 = vmatprep.mubr.bf16.mxu0 %v1293_v41 }
 0x269   : > { %v1138_v43 = vpop.f32.mrb[29].mxu1  ;;  %2744 = vmatmul.mubr.bf16.gmra.mrb[88].mxu0 %v1294_v40  ;;  %v1147_v45 = vadd.f32 %v2669_v42, %v3664_v30 }
 0x26a   : > { %v2670_v44 = vpop.f32.mrb[30].mxu1  ;;  %v1139_v48 = vadd.f32 %v3664_v30, %v1138_v43 }
 0x26b   : > { %v1150_v46 = vadd.f32 %v2670_v44, %v3664_v30  ;;  %v1141_v47 = vpop.f32.mrb[31].mxu1 }
 0x26c   : > { %v1142_v50 = vadd.f32 %v3664_v30, %v1141_v47 }
 0x26d   : > { %v1296_v51 = vpack.c.bf16 %v1150_v46, %v1147_v45 }
 0x26e   : > { %v1295_v52 = vpack.c.bf16 %v1142_v50, %v1139_v48 }
 0x270   : > { %v2673_v53 = vpop.f32.mrb[32].mxu1  ;;  %2747 = vmatprep.mubr.bf16.mxu0 %v1295_v52 }
 0x271   : > { %v1154_v54 = vpop.f32.mrb[33].mxu1  ;;  %2748 = vmatmul.mubr.bf16.gmra.mrb[92].mxu0 %v1296_v51  ;;  %v1163_v56 = vadd.f32 %v2673_v53, %v3664_v30 }
 0x272   : > { %v2674_v55 = vpop.f32.mrb[34].mxu1  ;;  %v1155_v59 = vadd.f32 %v3664_v30, %v1154_v54 }
 0x273   : > { %v1166_v57 = vadd.f32 %v2674_v55, %v3664_v30  ;;  %v1157_v58 = vpop.f32.mrb[35].mxu1 }
 0x274   : > { %v1158_v60 = vadd.f32 %v3664_v30, %v1157_v58 }
 0x275   : > { %v1298_v61 = vpack.c.bf16 %v1166_v57, %v1163_v56 }
 0x276   : > { %v1297_v62 = vpack.c.bf16 %v1158_v60, %v1155_v59 }
 0x278   : > { %v2677_v63 = vpop.f32.mrb[36].mxu1  ;;  %2751 = vmatprep.mubr.bf16.mxu0 %v1297_v62 }
 0x279   : > { %v1170_v0 = vpop.f32.mrb[37].mxu1  ;;  %2752 = vmatmul.mubr.bf16.gmra.mrb[96].mxu0 %v1298_v61  ;;  %v1179_v2 = vadd.f32 %v2677_v63, %v3664_v30 }
 0x27a   : > { %v2678_v1 = vpop.f32.mrb[38].mxu1  ;;  %v1171_v5 = vadd.f32 %v3664_v30, %v1170_v0 }
 0x27b   : > { %v1182_v3 = vadd.f32 %v2678_v1, %v3664_v30  ;;  %v1173_v4 = vpop.f32.mrb[39].mxu1 }
 0x27c   : > { %v1174_v6 = vadd.f32 %v3664_v30, %v1173_v4 }
 0x27d   : > { %v1300_v7 = vpack.c.bf16 %v1182_v3, %v1179_v2 }
 0x27e   : > { %v1299_v8 = vpack.c.bf16 %v1174_v6, %v1171_v5 }
 0x280   : > { %v2681_v9 = vpop.f32.mrb[40].mxu1  ;;  %2755 = vmatprep.mubr.bf16.mxu0 %v1299_v8 }
 0x281   : > { %v1186_v10 = vpop.f32.mrb[41].mxu1  ;;  %2756 = vmatmul.mubr.bf16.gmra.mrb[100].mxu0 %v1300_v7  ;;  %v1195_v12 = vadd.f32 %v2681_v9, %v3664_v30  ;;  %v3733_v7 = vld [vmem:[%s3988_s2 + $0x2] ss:$0 sm:$0xff] }
 0x282   : > { %v2682_v11 = vpop.f32.mrb[42].mxu1  ;;  %v1187_v15 = vadd.f32 %v3664_v30, %v1186_v10 }
 0x283   : > { %v1198_v13 = vadd.f32 %v2682_v11, %v3664_v30  ;;  %v1189_v14 = vpop.f32.mrb[43].mxu1 }
 0x284   : > { %v1190_v16 = vadd.f32 %v3664_v30, %v1189_v14 }
 0x285   : > { %v1302_v17 = vpack.c.bf16 %v1198_v13, %v1195_v12 }
 0x286   : > { %v1301_v18 = vpack.c.bf16 %v1190_v16, %v1187_v15 }
 0x288   : > { %v2685_v19 = vpop.f32.mrb[44].mxu1  ;;  %2759 = vmatprep.mubr.bf16.mxu0 %v1301_v18 }
 0x289   : > { %v1202_v20 = vpop.f32.mrb[45].mxu1  ;;  %2760 = vmatmul.mubr.bf16.gmra.mrb[104].mxu0 %v1302_v17  ;;  %v1211_v22 = vadd.f32 %v2685_v19, %v3664_v30 }
 0x28a   : > { %v2686_v21 = vpop.f32.mrb[46].mxu1  ;;  %v1203_v25 = vadd.f32 %v3664_v30, %v1202_v20 }
 0x28b   : > { %v1214_v23 = vadd.f32 %v2686_v21, %v3664_v30  ;;  %v1205_v24 = vpop.f32.mrb[47].mxu1 }
 0x28c   : > { %v1206_v26 = vadd.f32 %v3664_v30, %v1205_v24 }
 0x28d   : > { %v1304_v27 = vpack.c.bf16 %v1214_v23, %v1211_v22 }
 0x28e   : > { %v1303_v49 = vpack.c.bf16 %v1206_v26, %v1203_v25 }
 0x290   : > { %v2689_v28 = vpop.f32.mrb[48].mxu1  ;;  %2763 = vmatprep.mubr.bf16.mxu0 %v1303_v49 }
 0x291   : > { %v1218_v29 = vpop.f32.mrb[49].mxu1  ;;  %2764 = vmatmul.mubr.bf16.gmra.mrb[108].mxu0 %v1304_v27  ;;  %v1227_v33 = vadd.f32 %v2689_v28, %v3664_v30 }
 0x292   : > { %v2690_v31 = vpop.f32.mrb[50].mxu1  ;;  %v1219_v36 = vadd.f32 %v3664_v30, %v1218_v29 }
 0x293   : > { %v1230_v34 = vadd.f32 %v2690_v31, %v3664_v30  ;;  %v1221_v35 = vpop.f32.mrb[51].mxu1 }
 0x294   : > { %v1222_v37 = vadd.f32 %v3664_v30, %v1221_v35 }
 0x295   : > { %v1306_v38 = vpack.c.bf16 %v1230_v34, %v1227_v33 }
 0x296   : > { %v1305_v39 = vpack.c.bf16 %v1222_v37, %v1219_v36 }
 0x298   : > { %v2693_v40 = vpop.f32.mrb[52].mxu1  ;;  %2767 = vmatprep.mubr.bf16.mxu0 %v1305_v39 }
 0x299   : > { %v1234_v41 = vpop.f32.mrb[53].mxu1  ;;  %2768 = vmatmul.mubr.bf16.gmra.mrb[112].mxu0 %v1306_v38  ;;  %v1243_v43 = vadd.f32 %v2693_v40, %v3664_v30 }
 0x29a   : > { %v2694_v42 = vpop.f32.mrb[54].mxu1  ;;  %v1235_v46 = vadd.f32 %v3664_v30, %v1234_v41 }
 0x29b   : > { %v1246_v44 = vadd.f32 %v2694_v42, %v3664_v30  ;;  %v1237_v45 = vpop.f32.mrb[55].mxu1 }
 0x29c   : > { %v1238_v47 = vadd.f32 %v3664_v30, %v1237_v45 }
 0x29d   : > { %v1308_v48 = vpack.c.bf16 %v1246_v44, %v1243_v43 }
 0x29e   : > { %v1307_v50 = vpack.c.bf16 %v1238_v47, %v1235_v46 }
 0x2a0   : > { %v2697_v51 = vpop.f32.mrb[56].mxu1  ;;  %2771 = vmatprep.mubr.bf16.mxu0 %v1307_v50 }
 0x2a1   : > { %v1250_v52 = vpop.f32.mrb[57].mxu1  ;;  %2772 = vmatmul.mubr.bf16.gmra.mrb[116].mxu0 %v1308_v48  ;;  %v1259_v54 = vadd.f32 %v2697_v51, %v3664_v30 }
 0x2a2   : > { %v2698_v53 = vpop.f32.mrb[58].mxu1  ;;  %v1251_v57 = vadd.f32 %v3664_v30, %v1250_v52 }
 0x2a3   : > { %v1262_v55 = vadd.f32 %v2698_v53, %v3664_v30  ;;  %v1253_v56 = vpop.f32.mrb[59].mxu1 }
 0x2a4   : > { %v1254_v58 = vadd.f32 %v3664_v30, %v1253_v56 }
 0x2a5   : > { %v1310_v59 = vpack.c.bf16 %v1262_v55, %v1259_v54 }
 0x2a6   : > { %v1309_v60 = vpack.c.bf16 %v1254_v58, %v1251_v57 }
 0x2a8   : > { %v2701_v61 = vpop.f32.mrb[60].mxu1  ;;  %2775 = vmatprep.mubr.bf16.mxu0 %v1309_v60 }
 0x2a9   : > { %v1266_v62 = vpop.f32.mrb[61].mxu1  ;;  %2776 = vmatmul.mubr.bf16.gmra.mrb[120].mxu0 %v1310_v59  ;;  %v1275_v0 = vadd.f32 %v2701_v61, %v3664_v30 }
 0x2aa   : > { %v2702_v63 = vpop.f32.mrb[62].mxu1  ;;  %v1267_v3 = vadd.f32 %v3664_v30, %v1266_v62 }
 0x2ab   : > { %v1278_v1 = vadd.f32 %v2702_v63, %v3664_v30  ;;  %v1269_v2 = vpop.f32.mrb[63].mxu1 }
 0x2ac   : > { %v1270_v4 = vadd.f32 %v3664_v30, %v1269_v2 }
 0x2ad   : > { %v1312_v5 = vpack.c.bf16 %v1278_v1, %v1275_v0 }
 0x2ae   : > { %v1311_v6 = vpack.c.bf16 %v1270_v4, %v1267_v3 }
 0x2b0   : > { %2779 = vmatprep.mubr.bf16.mxu0 %v1311_v6 }
 0x2b1   : > { %2780 = vmatmul.mubr.bf16.gmra.mrb[124].mxu0 %v1312_v5 }
 0x30c   : > { %v2721_v8 = vpop.f32.mrb[64].mxu0 }
 0x30d   : > { %v1429_v9 = vadd.f32 %v2721_v8, %v3733_v7  ;;  %v1420_v10 = vpop.f32.mrb[65].mxu0 }
 0x30e   : > { %v1421_v11 = vadd.f32 %v3733_v7, %v1420_v10  ;;  %v2722_v12 = vpop.f32.mrb[66].mxu0 }
 0x30f   : > { %3116 = vtanh.f32 %v1429_v9  ;;  %v1432_v13 = vadd.f32 %v2722_v12, %v3733_v7  ;;  %v1423_v30 = vpop.f32.mrb[67].mxu0 }
 0x310   : > { %3118 = vtanh.f32 %v1421_v11  ;;  %v1424_v14 = vadd.f32 %v3733_v7, %v1423_v30 }
 0x311   : > { %3120 = vtanh.f32 %v1432_v13 }
 0x312   : > { %3122 = vtanh.f32 %v1424_v14 }
 0x314   : > { %v2725_v15 = vpop.f32.mrb[68].mxu0 }
 0x315   : > { %v1445_v16 = vadd.f32 %v2725_v15, %v3733_v7  ;;  %v1436_v17 = vpop.f32.mrb[69].mxu0 }
 0x316   : > { %v1437_v18 = vadd.f32 %v3733_v7, %v1436_v17  ;;  %v2726_v19 = vpop.f32.mrb[70].mxu0 }
 0x317   : > { %3124 = vtanh.f32 %v1445_v16  ;;  %v1448_v20 = vadd.f32 %v2726_v19, %v3733_v7  ;;  %v1439_v21 = vpop.f32.mrb[71].mxu0 }
 0x318   : > { %3126 = vtanh.f32 %v1437_v18  ;;  %v1440_v22 = vadd.f32 %v3733_v7, %v1439_v21 }
 0x319   : > { %v3117_v23 = vpop.eup %3116  ;;  %3128 = vtanh.f32 %v1448_v20 }
 0x31a   : > { %v3119_v24 = vpop.eup %3118  ;;  %3130 = vtanh.f32 %v1440_v22 }
 0x31b   : > { %v3121_v25 = vpop.eup %3120 }
 0x31c   : > { %v3123_v26 = vpop.eup %3122  ;;  %v2729_v27 = vpop.f32.mrb[72].mxu0  ;;  %v1740_v49 = vpack.c.bf16 %v3121_v25, %v3117_v23 }
 0x31d   : > { %v1461_v28 = vadd.f32 %v2729_v27, %v3733_v7  ;;  %v1452_v29 = vpop.f32.mrb[73].mxu0  ;;  %v1739_v31 = vpack.c.bf16 %v3123_v26, %v3119_v24 }
 0x31e   : > { %v1453_v32 = vadd.f32 %v3733_v7, %v1452_v29  ;;  %v2730_v33 = vpop.f32.mrb[74].mxu0 }
 0x31f   : > { %3132 = vtanh.f32 %v1461_v28  ;;  %v1464_v34 = vadd.f32 %v2730_v33, %v3733_v7  ;;  %v1455_v35 = vpop.f32.mrb[75].mxu0  ;;  %2799 = vmatprep.mubr.bf16.mxu1 %v1739_v31 }
 0x320   : > { %3134 = vtanh.f32 %v1453_v32  ;;  %v1456_v36 = vadd.f32 %v3733_v7, %v1455_v35  ;;  %2800 = vmatmul.mubr.bf16.vlgmr.msra.gmra.mrb[64].mxu1 %v1740_v49 }
 0x321   : > { %v3125_v37 = vpop.eup %3124  ;;  %3136 = vtanh.f32 %v1464_v34 }
 0x322   : > { %v3127_v38 = vpop.eup %3126  ;;  %3138 = vtanh.f32 %v1456_v36 }
 0x323   : > { %v3129_v39 = vpop.eup %3128 }
 0x324   : > { %v3131_v40 = vpop.eup %3130  ;;  %v2733_v41 = vpop.f32.mrb[76].mxu0  ;;  %v1742_v42 = vpack.c.bf16 %v3129_v39, %v3125_v37 }
 0x325   : > { %v1477_v43 = vadd.f32 %v2733_v41, %v3733_v7  ;;  %v1468_v44 = vpop.f32.mrb[77].mxu0  ;;  %v1741_v45 = vpack.c.bf16 %v3131_v40, %v3127_v38 }
 0x326   : > { %v1469_v46 = vadd.f32 %v3733_v7, %v1468_v44  ;;  %v2734_v47 = vpop.f32.mrb[78].mxu0 }
 0x327   : > { %3140 = vtanh.f32 %v1477_v43  ;;  %v1480_v48 = vadd.f32 %v2734_v47, %v3733_v7  ;;  %v1471_v50 = vpop.f32.mrb[79].mxu0  ;;  %2803 = vmatprep.mubr.bf16.mxu1 %v1741_v45 }
 0x328   : > { %3142 = vtanh.f32 %v1469_v46  ;;  %v1472_v51 = vadd.f32 %v3733_v7, %v1471_v50  ;;  %2804 = vmatmul.mubr.bf16.gmra.mrb[68].mxu1 %v1742_v42 }
 0x329   : > { %v3133_v52 = vpop.eup %3132  ;;  %3144 = vtanh.f32 %v1480_v48 }
 0x32a   : > { %v3135_v53 = vpop.eup %3134  ;;  %3146 = vtanh.f32 %v1472_v51 }
 0x32b   : > { %v3137_v54 = vpop.eup %3136 }
 0x32c   : > { %v3139_v55 = vpop.eup %3138  ;;  %v2737_v56 = vpop.f32.mrb[80].mxu0  ;;  %v1744_v57 = vpack.c.bf16 %v3137_v54, %v3133_v52 }
 0x32d   : > { %v1493_v58 = vadd.f32 %v2737_v56, %v3733_v7  ;;  %v1484_v59 = vpop.f32.mrb[81].mxu0  ;;  %v1743_v60 = vpack.c.bf16 %v3139_v55, %v3135_v53 }
 0x32e   : > { %v1485_v61 = vadd.f32 %v3733_v7, %v1484_v59  ;;  %v2738_v62 = vpop.f32.mrb[82].mxu0 }
 0x32f   : > { %3148 = vtanh.f32 %v1493_v58  ;;  %v1496_v63 = vadd.f32 %v2738_v62, %v3733_v7  ;;  %v1487_v0 = vpop.f32.mrb[83].mxu0  ;;  %2807 = vmatprep.mubr.bf16.mxu1 %v1743_v60 }
 0x330   : > { %3150 = vtanh.f32 %v1485_v61  ;;  %v1488_v1 = vadd.f32 %v3733_v7, %v1487_v0  ;;  %2808 = vmatmul.mubr.bf16.gmra.mrb[72].mxu1 %v1744_v57 }
 0x331   : > { %v3141_v2 = vpop.eup %3140  ;;  %3152 = vtanh.f32 %v1496_v63 }
 0x332   : > { %v3143_v3 = vpop.eup %3142  ;;  %3154 = vtanh.f32 %v1488_v1 }
 0x333   : > { %v3145_v4 = vpop.eup %3144 }
 0x334   : > { %v3147_v5 = vpop.eup %3146  ;;  %v2741_v6 = vpop.f32.mrb[84].mxu0  ;;  %v1746_v8 = vpack.c.bf16 %v3145_v4, %v3141_v2 }
 0x335   : > { %v1509_v9 = vadd.f32 %v2741_v6, %v3733_v7  ;;  %v1500_v10 = vpop.f32.mrb[85].mxu0  ;;  %v1745_v11 = vpack.c.bf16 %v3147_v5, %v3143_v3 }
 0x336   : > { %v1501_v12 = vadd.f32 %v3733_v7, %v1500_v10  ;;  %v2742_v13 = vpop.f32.mrb[86].mxu0 }
 0x337   : > { %3156 = vtanh.f32 %v1509_v9  ;;  %v1512_v30 = vadd.f32 %v2742_v13, %v3733_v7  ;;  %v1503_v14 = vpop.f32.mrb[87].mxu0  ;;  %2811 = vmatprep.mubr.bf16.mxu1 %v1745_v11 }
 0x338   : > { %3158 = vtanh.f32 %v1501_v12  ;;  %v1504_v15 = vadd.f32 %v3733_v7, %v1503_v14  ;;  %2812 = vmatmul.mubr.bf16.gmra.mrb[76].mxu1 %v1746_v8 }
 0x339   : > { %v3149_v16 = vpop.eup %3148  ;;  %3160 = vtanh.f32 %v1512_v30 }
 0x33a   : > { %v3151_v17 = vpop.eup %3150  ;;  %3162 = vtanh.f32 %v1504_v15 }
 0x33b   : > { %v3153_v18 = vpop.eup %3152 }
 0x33c   : > { %v3155_v19 = vpop.eup %3154  ;;  %v2745_v20 = vpop.f32.mrb[88].mxu0  ;;  %v1748_v21 = vpack.c.bf16 %v3153_v18, %v3149_v16 }
 0x33d   : > { %v1525_v22 = vadd.f32 %v2745_v20, %v3733_v7  ;;  %v1516_v23 = vpop.f32.mrb[89].mxu0  ;;  %v1747_v24 = vpack.c.bf16 %v3155_v19, %v3151_v17 }
 0x33e   : > { %v1517_v25 = vadd.f32 %v3733_v7, %v1516_v23  ;;  %v2746_v26 = vpop.f32.mrb[90].mxu0 }
 0x33f   : > { %3164 = vtanh.f32 %v1525_v22  ;;  %v1528_v27 = vadd.f32 %v2746_v26, %v3733_v7  ;;  %v1519_v49 = vpop.f32.mrb[91].mxu0  ;;  %2815 = vmatprep.mubr.bf16.mxu1 %v1747_v24 }
 0x340   : > { %3166 = vtanh.f32 %v1517_v25  ;;  %v1520_v28 = vadd.f32 %v3733_v7, %v1519_v49  ;;  %2816 = vmatmul.mubr.bf16.gmra.mrb[80].mxu1 %v1748_v21 }
 0x341   : > { %v3157_v29 = vpop.eup %3156  ;;  %3168 = vtanh.f32 %v1528_v27 }
 0x342   : > { %v3159_v31 = vpop.eup %3158  ;;  %3170 = vtanh.f32 %v1520_v28 }
 0x343   : > { %v3161_v32 = vpop.eup %3160 }
 0x344   : > { %v3163_v33 = vpop.eup %3162  ;;  %v2749_v34 = vpop.f32.mrb[92].mxu0  ;;  %v1750_v35 = vpack.c.bf16 %v3161_v32, %v3157_v29 }
 0x345   : > { %v1541_v36 = vadd.f32 %v2749_v34, %v3733_v7  ;;  %v1532_v37 = vpop.f32.mrb[93].mxu0  ;;  %v1749_v38 = vpack.c.bf16 %v3163_v33, %v3159_v31 }
 0x346   : > { %v1533_v39 = vadd.f32 %v3733_v7, %v1532_v37  ;;  %v2750_v40 = vpop.f32.mrb[94].mxu0 }
 0x347   : > { %3172 = vtanh.f32 %v1541_v36  ;;  %v1544_v41 = vadd.f32 %v2750_v40, %v3733_v7  ;;  %v1535_v42 = vpop.f32.mrb[95].mxu0  ;;  %2819 = vmatprep.mubr.bf16.mxu1 %v1749_v38 }
 0x348   : > { %3174 = vtanh.f32 %v1533_v39  ;;  %v1536_v43 = vadd.f32 %v3733_v7, %v1535_v42  ;;  %2820 = vmatmul.mubr.bf16.gmra.mrb[84].mxu1 %v1750_v35 }
 0x349   : > { %v3165_v44 = vpop.eup %3164  ;;  %3176 = vtanh.f32 %v1544_v41 }
 0x34a   : > { %v3167_v45 = vpop.eup %3166  ;;  %3178 = vtanh.f32 %v1536_v43 }
 0x34b   : > { %v3169_v46 = vpop.eup %3168 }
 0x34c   : > { %v3171_v47 = vpop.eup %3170  ;;  %v2753_v48 = vpop.f32.mrb[96].mxu0  ;;  %v1752_v50 = vpack.c.bf16 %v3169_v46, %v3165_v44 }
 0x34d   : > { %v1557_v51 = vadd.f32 %v2753_v48, %v3733_v7  ;;  %v1548_v52 = vpop.f32.mrb[97].mxu0  ;;  %v1751_v53 = vpack.c.bf16 %v3171_v47, %v3167_v45 }
 0x34e   : > { %v1549_v54 = vadd.f32 %v3733_v7, %v1548_v52  ;;  %v2754_v55 = vpop.f32.mrb[98].mxu0 }
 0x34f   : > { %3180 = vtanh.f32 %v1557_v51  ;;  %v1560_v56 = vadd.f32 %v2754_v55, %v3733_v7  ;;  %v1551_v57 = vpop.f32.mrb[99].mxu0  ;;  %2823 = vmatprep.mubr.bf16.mxu1 %v1751_v53 }
 0x350   : > { %3182 = vtanh.f32 %v1549_v54  ;;  %v1552_v58 = vadd.f32 %v3733_v7, %v1551_v57  ;;  %2824 = vmatmul.mubr.bf16.gmra.mrb[88].mxu1 %v1752_v50 }
 0x351   : > { %v3173_v59 = vpop.eup %3172  ;;  %3184 = vtanh.f32 %v1560_v56 }
 0x352   : > { %v3175_v60 = vpop.eup %3174  ;;  %3186 = vtanh.f32 %v1552_v58 }
 0x353   : > { %v3177_v61 = vpop.eup %3176 }
 0x354   : > { %v3179_v62 = vpop.eup %3178  ;;  %v2757_v63 = vpop.f32.mrb[100].mxu0  ;;  %v1754_v0 = vpack.c.bf16 %v3177_v61, %v3173_v59 }
 0x355   : > { %v1573_v1 = vadd.f32 %v2757_v63, %v3733_v7  ;;  %v1564_v2 = vpop.f32.mrb[101].mxu0  ;;  %v1753_v3 = vpack.c.bf16 %v3179_v62, %v3175_v60 }
 0x356   : > { %v1565_v4 = vadd.f32 %v3733_v7, %v1564_v2  ;;  %v2758_v5 = vpop.f32.mrb[102].mxu0 }
 0x357   : > { %3188 = vtanh.f32 %v1573_v1  ;;  %v1576_v6 = vadd.f32 %v2758_v5, %v3733_v7  ;;  %v1567_v8 = vpop.f32.mrb[103].mxu0  ;;  %2827 = vmatprep.mubr.bf16.mxu1 %v1753_v3 }
 0x358   : > { %3190 = vtanh.f32 %v1565_v4  ;;  %v1568_v9 = vadd.f32 %v3733_v7, %v1567_v8  ;;  %2828 = vmatmul.mubr.bf16.gmra.mrb[92].mxu1 %v1754_v0 }
 0x359   : > { %v3181_v10 = vpop.eup %3180  ;;  %3192 = vtanh.f32 %v1576_v6 }
 0x35a   : > { %v3183_v11 = vpop.eup %3182  ;;  %3194 = vtanh.f32 %v1568_v9 }
 0x35b   : > { %v3185_v12 = vpop.eup %3184 }
 0x35c   : > { %v3187_v13 = vpop.eup %3186  ;;  %v2761_v30 = vpop.f32.mrb[104].mxu0  ;;  %v1756_v14 = vpack.c.bf16 %v3185_v12, %v3181_v10 }
 0x35d   : > { %v1589_v15 = vadd.f32 %v2761_v30, %v3733_v7  ;;  %v1580_v16 = vpop.f32.mrb[105].mxu0  ;;  %v1755_v17 = vpack.c.bf16 %v3187_v13, %v3183_v11 }
 0x35e   : > { %v1581_v18 = vadd.f32 %v3733_v7, %v1580_v16  ;;  %v2762_v19 = vpop.f32.mrb[106].mxu0 }
 0x35f   : > { %3196 = vtanh.f32 %v1589_v15  ;;  %v1592_v20 = vadd.f32 %v2762_v19, %v3733_v7  ;;  %v1583_v21 = vpop.f32.mrb[107].mxu0  ;;  %2831 = vmatprep.mubr.bf16.mxu1 %v1755_v17 }
 0x360   : > { %3198 = vtanh.f32 %v1581_v18  ;;  %v1584_v22 = vadd.f32 %v3733_v7, %v1583_v21  ;;  %2832 = vmatmul.mubr.bf16.gmra.mrb[96].mxu1 %v1756_v14 }
 0x361   : > { %v3189_v23 = vpop.eup %3188  ;;  %3200 = vtanh.f32 %v1592_v20 }
 0x362   : > { %v3191_v24 = vpop.eup %3190  ;;  %3202 = vtanh.f32 %v1584_v22 }
 0x363   : > { %v3193_v25 = vpop.eup %3192 }
 0x364   : > { %v3195_v26 = vpop.eup %3194  ;;  %v2765_v27 = vpop.f32.mrb[108].mxu0  ;;  %v1758_v49 = vpack.c.bf16 %v3193_v25, %v3189_v23 }
 0x365   : > { %v1605_v28 = vadd.f32 %v2765_v27, %v3733_v7  ;;  %v1596_v29 = vpop.f32.mrb[109].mxu0  ;;  %v1757_v31 = vpack.c.bf16 %v3195_v26, %v3191_v24 }
 0x366   : > { %v1597_v32 = vadd.f32 %v3733_v7, %v1596_v29  ;;  %v2766_v33 = vpop.f32.mrb[110].mxu0 }
 0x367   : > { %3204 = vtanh.f32 %v1605_v28  ;;  %v1608_v34 = vadd.f32 %v2766_v33, %v3733_v7  ;;  %v1599_v35 = vpop.f32.mrb[111].mxu0  ;;  %2835 = vmatprep.mubr.bf16.mxu1 %v1757_v31 }
 0x368   : > { %3206 = vtanh.f32 %v1597_v32  ;;  %v1600_v36 = vadd.f32 %v3733_v7, %v1599_v35  ;;  %2836 = vmatmul.mubr.bf16.gmra.mrb[100].mxu1 %v1758_v49 }
 0x369   : > { %v3197_v37 = vpop.eup %3196  ;;  %3208 = vtanh.f32 %v1608_v34 }
 0x36a   : > { %v3199_v38 = vpop.eup %3198  ;;  %3210 = vtanh.f32 %v1600_v36 }
 0x36b   : > { %v3201_v39 = vpop.eup %3200 }
 0x36c   : > { %v3203_v40 = vpop.eup %3202  ;;  %v2769_v41 = vpop.f32.mrb[112].mxu0  ;;  %v1760_v42 = vpack.c.bf16 %v3201_v39, %v3197_v37 }
 0x36d   : > { %v1621_v43 = vadd.f32 %v2769_v41, %v3733_v7  ;;  %v1612_v44 = vpop.f32.mrb[113].mxu0  ;;  %v1759_v45 = vpack.c.bf16 %v3203_v40, %v3199_v38 }
 0x36e   : > { %v1613_v46 = vadd.f32 %v3733_v7, %v1612_v44  ;;  %v2770_v47 = vpop.f32.mrb[114].mxu0 }
 0x36f   : > { %3212 = vtanh.f32 %v1621_v43  ;;  %v1624_v48 = vadd.f32 %v2770_v47, %v3733_v7  ;;  %v1615_v50 = vpop.f32.mrb[115].mxu0  ;;  %2839 = vmatprep.mubr.bf16.mxu1 %v1759_v45 }
 0x370   : > { %3214 = vtanh.f32 %v1613_v46  ;;  %v1616_v51 = vadd.f32 %v3733_v7, %v1615_v50  ;;  %2840 = vmatmul.mubr.bf16.gmra.mrb[104].mxu1 %v1760_v42 }
 0x371   : > { %v3205_v52 = vpop.eup %3204  ;;  %3216 = vtanh.f32 %v1624_v48 }
 0x372   : > { %v3207_v53 = vpop.eup %3206  ;;  %3218 = vtanh.f32 %v1616_v51 }
 0x373   : > { %v3209_v54 = vpop.eup %3208 }
 0x374   : > { %v3211_v55 = vpop.eup %3210  ;;  %v2773_v56 = vpop.f32.mrb[116].mxu0  ;;  %v1762_v57 = vpack.c.bf16 %v3209_v54, %v3205_v52 }
 0x375   : > { %v1637_v58 = vadd.f32 %v2773_v56, %v3733_v7  ;;  %v1628_v59 = vpop.f32.mrb[117].mxu0  ;;  %v1761_v60 = vpack.c.bf16 %v3211_v55, %v3207_v53 }
 0x376   : > { %v1629_v61 = vadd.f32 %v3733_v7, %v1628_v59  ;;  %v2774_v62 = vpop.f32.mrb[118].mxu0 }
 0x377   : > { %3220 = vtanh.f32 %v1637_v58  ;;  %v1640_v63 = vadd.f32 %v2774_v62, %v3733_v7  ;;  %v1631_v0 = vpop.f32.mrb[119].mxu0  ;;  %2843 = vmatprep.mubr.bf16.mxu1 %v1761_v60 }
 0x378   : > { %3222 = vtanh.f32 %v1629_v61  ;;  %v1632_v1 = vadd.f32 %v3733_v7, %v1631_v0  ;;  %2844 = vmatmul.mubr.bf16.gmra.mrb[108].mxu1 %v1762_v57 }
 0x379   : > { %v3213_v2 = vpop.eup %3212  ;;  %3224 = vtanh.f32 %v1640_v63 }
 0x37a   : > { %v3215_v3 = vpop.eup %3214  ;;  %3226 = vtanh.f32 %v1632_v1 }
 0x37b   : > { %v3217_v4 = vpop.eup %3216 }
 0x37c   : > { %v3219_v5 = vpop.eup %3218  ;;  %v2777_v6 = vpop.f32.mrb[120].mxu0  ;;  %v1764_v8 = vpack.c.bf16 %v3217_v4, %v3213_v2 }
 0x37d   : > { %v1653_v9 = vadd.f32 %v2777_v6, %v3733_v7  ;;  %v1644_v10 = vpop.f32.mrb[121].mxu0  ;;  %v1763_v11 = vpack.c.bf16 %v3219_v5, %v3215_v3 }
 0x37e   : > { %v1645_v12 = vadd.f32 %v3733_v7, %v1644_v10  ;;  %v2778_v13 = vpop.f32.mrb[122].mxu0 }
 0x37f   : > { %3228 = vtanh.f32 %v1653_v9  ;;  %v1656_v30 = vadd.f32 %v2778_v13, %v3733_v7  ;;  %v1647_v14 = vpop.f32.mrb[123].mxu0  ;;  %2847 = vmatprep.mubr.bf16.mxu1 %v1763_v11 }
 0x380   : > { %3230 = vtanh.f32 %v1645_v12  ;;  %v1648_v15 = vadd.f32 %v3733_v7, %v1647_v14  ;;  %2848 = vmatmul.mubr.bf16.gmra.mrb[112].mxu1 %v1764_v8 }
 0x381   : > { %v3221_v16 = vpop.eup %3220  ;;  %3232 = vtanh.f32 %v1656_v30 }
 0x382   : > { %v3223_v17 = vpop.eup %3222  ;;  %3234 = vtanh.f32 %v1648_v15 }
 0x383   : > { %v3225_v18 = vpop.eup %3224 }
 0x384   : > { %v3227_v19 = vpop.eup %3226  ;;  %v2781_v20 = vpop.f32.mrb[124].mxu0  ;;  %v1766_v21 = vpack.c.bf16 %v3225_v18, %v3221_v16 }
 0x385   : > { %v1669_v22 = vadd.f32 %v2781_v20, %v3733_v7  ;;  %v1660_v23 = vpop.f32.mrb[125].mxu0  ;;  %v1765_v24 = vpack.c.bf16 %v3227_v19, %v3223_v17 }
 0x386   : > { %v1661_v25 = vadd.f32 %v3733_v7, %v1660_v23  ;;  %v2782_v26 = vpop.f32.mrb[126].mxu0 }
 0x387   : > { %3236 = vtanh.f32 %v1669_v22  ;;  %v1672_v27 = vadd.f32 %v2782_v26, %v3733_v7  ;;  %v1663_v49 = vpop.f32.mrb[127].mxu0  ;;  %2851 = vmatprep.mubr.bf16.mxu1 %v1765_v24 }
 0x388   : > { %3238 = vtanh.f32 %v1661_v25  ;;  %v1664_v28 = vadd.f32 %v3733_v7, %v1663_v49  ;;  %2852 = vmatmul.mubr.bf16.gmra.mrb[116].mxu1 %v1766_v21  ;;  %v3803_v7 = vld [vmem:[%s3988_s2 + $0x3] ss:$0 sm:$0xff] }
 0x389   : > { %v3229_v29 = vpop.eup %3228  ;;  %3240 = vtanh.f32 %v1672_v27 }
 0x38a   : > { %v3231_v31 = vpop.eup %3230  ;;  %3242 = vtanh.f32 %v1664_v28 }
 0x38b   : > { %v3233_v32 = vpop.eup %3232 }
 0x38c   : > { %v3235_v33 = vpop.eup %3234  ;;  %v1768_v34 = vpack.c.bf16 %v3233_v32, %v3229_v29 }
 0x38d   : > { %v1767_v35 = vpack.c.bf16 %v3235_v33, %v3231_v31 }
 0x38f   : > { %2855 = vmatprep.mubr.bf16.mxu1 %v1767_v35 }
 0x390   : > { %2856 = vmatmul.mubr.bf16.gmra.mrb[120].mxu1 %v1768_v34 }
 0x391   : > { %v3237_v36 = vpop.eup %3236 }
 0x392   : > { %v3239_v37 = vpop.eup %3238 }
 0x393   : > { %v3241_v38 = vpop.eup %3240 }
 0x394   : > { %v3243_v39 = vpop.eup %3242  ;;  %v1770_v40 = vpack.c.bf16 %v3241_v38, %v3237_v36 }
 0x395   : > { %v1769_v41 = vpack.c.bf16 %v3243_v39, %v3239_v37 }
 0x397   : > { %2859 = vmatprep.mubr.bf16.mxu1 %v1769_v41 }
 0x398   : > { %2860 = vmatmul.mubr.bf16.gmra.mrb[124].mxu1 %v1770_v40 }
 0x3f3   : > { %v2801_v42 = vpop.f32.mrb[64].mxu1 }
 0x3f4   : > { %v1887_v43 = vadd.f32 %v2801_v42, %v3803_v7  ;;  %v1878_v44 = vpop.f32.mrb[65].mxu1 }
 0x3f5   : > { %v1879_v45 = vadd.f32 %v3803_v7, %v1878_v44  ;;  %v2802_v46 = vpop.f32.mrb[66].mxu1 }
 0x3f6   : > { %2135 = vst [vmem:[%s3807_s28 + $0x10] sm:$0xff] %v1887_v43  ;;  %v1890_v47 = vadd.f32 %v2802_v46, %v3803_v7  ;;  %v1881_v48 = vpop.f32.mrb[67].mxu1 }
 0x3f7   : > { %2133 = vst [vmem:[%s3807_s28] sm:$0xff] %v1879_v45  ;;  %v1882_v50 = vadd.f32 %v3803_v7, %v1881_v48 }
 0x3f8   : > { %2136 = vst [vmem:[%s3807_s28 + $0x18] sm:$0xff] %v1890_v47 }
 0x3f9   : > { %2134 = vst [vmem:[%s3807_s28 + $0x8] sm:$0xff] %v1882_v50 }
 0x3fb   : > { %v2805_v51 = vpop.f32.mrb[68].mxu1 }
 0x3fc   : > { %v1903_v52 = vadd.f32 %v2805_v51, %v3803_v7  ;;  %v1894_v53 = vpop.f32.mrb[69].mxu1 }
 0x3fd   : > { %v1895_v54 = vadd.f32 %v3803_v7, %v1894_v53  ;;  %v2806_v55 = vpop.f32.mrb[70].mxu1 }
 0x3fe   : > { %2139 = vst [vmem:[%s3807_s28 + $0x30] sm:$0xff] %v1903_v52  ;;  %v1906_v56 = vadd.f32 %v2806_v55, %v3803_v7  ;;  %v1897_v57 = vpop.f32.mrb[71].mxu1 }
 0x3ff   : > { %2137 = vst [vmem:[%s3807_s28 + $0x20] sm:$0xff] %v1895_v54  ;;  %v1898_v58 = vadd.f32 %v3803_v7, %v1897_v57 }
 0x400   : > { %2140 = vst [vmem:[%s3807_s28 + $0x38] sm:$0xff] %v1906_v56 }
 0x401   : > { %2138 = vst [vmem:[%s3807_s28 + $0x28] sm:$0xff] %v1898_v58 }
 0x403   : > { %v2809_v59 = vpop.f32.mrb[72].mxu1 }
 0x404   : > { %v1919_v60 = vadd.f32 %v2809_v59, %v3803_v7  ;;  %v1910_v61 = vpop.f32.mrb[73].mxu1 }
 0x405   : > { %v1911_v62 = vadd.f32 %v3803_v7, %v1910_v61  ;;  %v2810_v63 = vpop.f32.mrb[74].mxu1 }
 0x406   : > { %2143 = vst [vmem:[%s3807_s28 + $0x50] sm:$0xff] %v1919_v60  ;;  %v1922_v0 = vadd.f32 %v2810_v63, %v3803_v7  ;;  %v1913_v1 = vpop.f32.mrb[75].mxu1 }
 0x407   : > { %2141 = vst [vmem:[%s3807_s28 + $0x40] sm:$0xff] %v1911_v62  ;;  %v1914_v2 = vadd.f32 %v3803_v7, %v1913_v1 }
 0x408   : > { %2144 = vst [vmem:[%s3807_s28 + $0x58] sm:$0xff] %v1922_v0 }
 0x409   : > { %2142 = vst [vmem:[%s3807_s28 + $0x48] sm:$0xff] %v1914_v2 }
 0x40b   : > { %v2813_v3 = vpop.f32.mrb[76].mxu1 }
 0x40c   : > { %v1935_v4 = vadd.f32 %v2813_v3, %v3803_v7  ;;  %v1926_v5 = vpop.f32.mrb[77].mxu1 }
 0x40d   : > { %v1927_v6 = vadd.f32 %v3803_v7, %v1926_v5  ;;  %v2814_v8 = vpop.f32.mrb[78].mxu1 }
 0x40e   : > { %2147 = vst [vmem:[%s3807_s28 + $0x70] sm:$0xff] %v1935_v4  ;;  %v1938_v9 = vadd.f32 %v2814_v8, %v3803_v7  ;;  %v1929_v10 = vpop.f32.mrb[79].mxu1 }
 0x40f   : > { %2145 = vst [vmem:[%s3807_s28 + $0x60] sm:$0xff] %v1927_v6  ;;  %v1930_v11 = vadd.f32 %v3803_v7, %v1929_v10 }
 0x410   : > { %2148 = vst [vmem:[%s3807_s28 + $0x78] sm:$0xff] %v1938_v9 }
 0x411   : > { %2146 = vst [vmem:[%s3807_s28 + $0x68] sm:$0xff] %v1930_v11 }
 0x413   : > { %v2817_v12 = vpop.f32.mrb[80].mxu1 }
 0x414   : > { %v1951_v13 = vadd.f32 %v2817_v12, %v3803_v7  ;;  %v1942_v30 = vpop.f32.mrb[81].mxu1 }
 0x415   : > { %v1943_v14 = vadd.f32 %v3803_v7, %v1942_v30  ;;  %v2818_v15 = vpop.f32.mrb[82].mxu1 }
 0x416   : > { %2151 = vst [vmem:[%s3807_s28 + $0x90] sm:$0xff] %v1951_v13  ;;  %v1954_v16 = vadd.f32 %v2818_v15, %v3803_v7  ;;  %v1945_v17 = vpop.f32.mrb[83].mxu1 }
 0x417   : > { %2149 = vst [vmem:[%s3807_s28 + $0x80] sm:$0xff] %v1943_v14  ;;  %v1946_v18 = vadd.f32 %v3803_v7, %v1945_v17 }
 0x418   : > { %2152 = vst [vmem:[%s3807_s28 + $0x98] sm:$0xff] %v1954_v16 }
 0x419   : > { %2150 = vst [vmem:[%s3807_s28 + $0x88] sm:$0xff] %v1946_v18 }
 0x41b   : > { %v2821_v19 = vpop.f32.mrb[84].mxu1 }
 0x41c   : > { %v1967_v20 = vadd.f32 %v2821_v19, %v3803_v7  ;;  %v1958_v21 = vpop.f32.mrb[85].mxu1 }
 0x41d   : > { %v1959_v22 = vadd.f32 %v3803_v7, %v1958_v21  ;;  %v2822_v23 = vpop.f32.mrb[86].mxu1 }
 0x41e   : > { %2155 = vst [vmem:[%s3807_s28 + $0xb0] sm:$0xff] %v1967_v20  ;;  %v1970_v24 = vadd.f32 %v2822_v23, %v3803_v7  ;;  %v1961_v25 = vpop.f32.mrb[87].mxu1 }
 0x41f   : > { %2153 = vst [vmem:[%s3807_s28 + $0xa0] sm:$0xff] %v1959_v22  ;;  %v1962_v26 = vadd.f32 %v3803_v7, %v1961_v25 }
 0x420   : > { %2156 = vst [vmem:[%s3807_s28 + $0xb8] sm:$0xff] %v1970_v24 }
 0x421   : > { %2154 = vst [vmem:[%s3807_s28 + $0xa8] sm:$0xff] %v1962_v26 }
 0x423   : > { %v2825_v27 = vpop.f32.mrb[88].mxu1 }
 0x424   : > { %v1983_v49 = vadd.f32 %v2825_v27, %v3803_v7  ;;  %v1974_v28 = vpop.f32.mrb[89].mxu1 }
 0x425   : > { %v1975_v29 = vadd.f32 %v3803_v7, %v1974_v28  ;;  %v2826_v31 = vpop.f32.mrb[90].mxu1 }
 0x426   : > { %2159 = vst [vmem:[%s3807_s28 + $0xd0] sm:$0xff] %v1983_v49  ;;  %v1986_v32 = vadd.f32 %v2826_v31, %v3803_v7  ;;  %v1977_v33 = vpop.f32.mrb[91].mxu1 }
 0x427   : > { %2157 = vst [vmem:[%s3807_s28 + $0xc0] sm:$0xff] %v1975_v29  ;;  %v1978_v34 = vadd.f32 %v3803_v7, %v1977_v33 }
 0x428   : > { %2160 = vst [vmem:[%s3807_s28 + $0xd8] sm:$0xff] %v1986_v32 }
 0x429   : > { %2158 = vst [vmem:[%s3807_s28 + $0xc8] sm:$0xff] %v1978_v34 }
 0x42b   : > { %v2829_v35 = vpop.f32.mrb[92].mxu1 }
 0x42c   : > { %v1999_v36 = vadd.f32 %v2829_v35, %v3803_v7  ;;  %v1990_v37 = vpop.f32.mrb[93].mxu1 }
 0x42d   : > { %v1991_v38 = vadd.f32 %v3803_v7, %v1990_v37  ;;  %v2830_v39 = vpop.f32.mrb[94].mxu1 }
 0x42e   : > { %2163 = vst [vmem:[%s3807_s28 + $0xf0] sm:$0xff] %v1999_v36  ;;  %v2002_v40 = vadd.f32 %v2830_v39, %v3803_v7  ;;  %v1993_v41 = vpop.f32.mrb[95].mxu1 }
 0x42f   : > { %2161 = vst [vmem:[%s3807_s28 + $0xe0] sm:$0xff] %v1991_v38  ;;  %v1994_v42 = vadd.f32 %v3803_v7, %v1993_v41 }
 0x430   : > { %2164 = vst [vmem:[%s3807_s28 + $0xf8] sm:$0xff] %v2002_v40 }
 0x431   : > { %2162 = vst [vmem:[%s3807_s28 + $0xe8] sm:$0xff] %v1994_v42 }
 0x433   : > { %v2833_v43 = vpop.f32.mrb[96].mxu1 }
 0x434   : > { %v2015_v44 = vadd.f32 %v2833_v43, %v3803_v7  ;;  %v2006_v45 = vpop.f32.mrb[97].mxu1 }
 0x435   : > { %v2007_v46 = vadd.f32 %v3803_v7, %v2006_v45  ;;  %v2834_v47 = vpop.f32.mrb[98].mxu1 }
 0x436   : > { %2167 = vst [vmem:[%s3807_s28 + $0x110] sm:$0xff] %v2015_v44  ;;  %v2018_v48 = vadd.f32 %v2834_v47, %v3803_v7  ;;  %v2009_v50 = vpop.f32.mrb[99].mxu1 }
 0x437   : > { %2165 = vst [vmem:[%s3807_s28 + $0x100] sm:$0xff] %v2007_v46  ;;  %v2010_v51 = vadd.f32 %v3803_v7, %v2009_v50 }
 0x438   : > { %2168 = vst [vmem:[%s3807_s28 + $0x118] sm:$0xff] %v2018_v48 }
 0x439   : > { %2166 = vst [vmem:[%s3807_s28 + $0x108] sm:$0xff] %v2010_v51 }
 0x43b   : > { %v2837_v52 = vpop.f32.mrb[100].mxu1 }
 0x43c   : > { %v2031_v53 = vadd.f32 %v2837_v52, %v3803_v7  ;;  %v2022_v54 = vpop.f32.mrb[101].mxu1 }
 0x43d   : > { %v2023_v55 = vadd.f32 %v3803_v7, %v2022_v54  ;;  %v2838_v56 = vpop.f32.mrb[102].mxu1 }
 0x43e   : > { %2171 = vst [vmem:[%s3807_s28 + $0x130] sm:$0xff] %v2031_v53  ;;  %v2034_v57 = vadd.f32 %v2838_v56, %v3803_v7  ;;  %v2025_v58 = vpop.f32.mrb[103].mxu1 }
 0x43f   : > { %2169 = vst [vmem:[%s3807_s28 + $0x120] sm:$0xff] %v2023_v55  ;;  %v2026_v59 = vadd.f32 %v3803_v7, %v2025_v58 }
 0x440   : > { %2172 = vst [vmem:[%s3807_s28 + $0x138] sm:$0xff] %v2034_v57 }
 0x441   : > { %2170 = vst [vmem:[%s3807_s28 + $0x128] sm:$0xff] %v2026_v59 }
 0x443   : > { %v2841_v60 = vpop.f32.mrb[104].mxu1 }
 0x444   : > { %v2047_v61 = vadd.f32 %v2841_v60, %v3803_v7  ;;  %v2038_v62 = vpop.f32.mrb[105].mxu1 }
 0x445   : > { %v2039_v63 = vadd.f32 %v3803_v7, %v2038_v62  ;;  %v2842_v0 = vpop.f32.mrb[106].mxu1 }
 0x446   : > { %2175 = vst [vmem:[%s3807_s28 + $0x150] sm:$0xff] %v2047_v61  ;;  %v2050_v1 = vadd.f32 %v2842_v0, %v3803_v7  ;;  %v2041_v2 = vpop.f32.mrb[107].mxu1 }
 0x447   : > { %2173 = vst [vmem:[%s3807_s28 + $0x140] sm:$0xff] %v2039_v63  ;;  %v2042_v3 = vadd.f32 %v3803_v7, %v2041_v2 }
 0x448   : > { %2176 = vst [vmem:[%s3807_s28 + $0x158] sm:$0xff] %v2050_v1 }
 0x449   : > { %2174 = vst [vmem:[%s3807_s28 + $0x148] sm:$0xff] %v2042_v3 }
 0x44b   : > { %v2845_v4 = vpop.f32.mrb[108].mxu1 }
 0x44c   : > { %v2063_v5 = vadd.f32 %v2845_v4, %v3803_v7  ;;  %v2054_v6 = vpop.f32.mrb[109].mxu1 }
 0x44d   : > { %v2055_v8 = vadd.f32 %v3803_v7, %v2054_v6  ;;  %v2846_v9 = vpop.f32.mrb[110].mxu1 }
 0x44e   : > { %2179 = vst [vmem:[%s3807_s28 + $0x170] sm:$0xff] %v2063_v5  ;;  %v2066_v10 = vadd.f32 %v2846_v9, %v3803_v7  ;;  %v2057_v11 = vpop.f32.mrb[111].mxu1 }
 0x44f   : > { %2177 = vst [vmem:[%s3807_s28 + $0x160] sm:$0xff] %v2055_v8  ;;  %v2058_v12 = vadd.f32 %v3803_v7, %v2057_v11 }
 0x450   : > { %2180 = vst [vmem:[%s3807_s28 + $0x178] sm:$0xff] %v2066_v10 }
 0x451   : > { %2178 = vst [vmem:[%s3807_s28 + $0x168] sm:$0xff] %v2058_v12 }
 0x453   : > { %v2849_v13 = vpop.f32.mrb[112].mxu1 }
 0x454   : > { %v2079_v30 = vadd.f32 %v2849_v13, %v3803_v7  ;;  %v2070_v14 = vpop.f32.mrb[113].mxu1 }
 0x455   : > { %v2071_v15 = vadd.f32 %v3803_v7, %v2070_v14  ;;  %v2850_v16 = vpop.f32.mrb[114].mxu1 }
 0x456   : > { %2183 = vst [vmem:[%s3807_s28 + $0x190] sm:$0xff] %v2079_v30  ;;  %v2082_v17 = vadd.f32 %v2850_v16, %v3803_v7  ;;  %v2073_v18 = vpop.f32.mrb[115].mxu1 }
 0x457   : > { %2181 = vst [vmem:[%s3807_s28 + $0x180] sm:$0xff] %v2071_v15  ;;  %v2074_v19 = vadd.f32 %v3803_v7, %v2073_v18 }
 0x458   : > { %2184 = vst [vmem:[%s3807_s28 + $0x198] sm:$0xff] %v2082_v17 }
 0x459   : > { %2182 = vst [vmem:[%s3807_s28 + $0x188] sm:$0xff] %v2074_v19 }
 0x45b   : > { %v2853_v20 = vpop.f32.mrb[116].mxu1 }
 0x45c   : > { %v2095_v21 = vadd.f32 %v2853_v20, %v3803_v7  ;;  %v2086_v22 = vpop.f32.mrb[117].mxu1 }
 0x45d   : > { %v2087_v23 = vadd.f32 %v3803_v7, %v2086_v22  ;;  %v2854_v24 = vpop.f32.mrb[118].mxu1 }
 0x45e   : > { %2187 = vst [vmem:[%s3807_s28 + $0x1b0] sm:$0xff] %v2095_v21  ;;  %v2098_v25 = vadd.f32 %v2854_v24, %v3803_v7  ;;  %v2089_v26 = vpop.f32.mrb[119].mxu1 }
 0x45f   : > { %2185 = vst [vmem:[%s3807_s28 + $0x1a0] sm:$0xff] %v2087_v23  ;;  %v2090_v27 = vadd.f32 %v3803_v7, %v2089_v26 }
 0x460   : > { %2188 = vst [vmem:[%s3807_s28 + $0x1b8] sm:$0xff] %v2098_v25 }
 0x461   : > { %2186 = vst [vmem:[%s3807_s28 + $0x1a8] sm:$0xff] %v2090_v27 }
 0x463   : > { %v2857_v49 = vpop.f32.mrb[120].mxu1 }
 0x464   : > { %v2111_v28 = vadd.f32 %v2857_v49, %v3803_v7  ;;  %v2102_v29 = vpop.f32.mrb[121].mxu1 }
 0x465   : > { %v2103_v31 = vadd.f32 %v3803_v7, %v2102_v29  ;;  %v2858_v32 = vpop.f32.mrb[122].mxu1 }
 0x466   : > { %2191 = vst [vmem:[%s3807_s28 + $0x1d0] sm:$0xff] %v2111_v28  ;;  %v2114_v33 = vadd.f32 %v2858_v32, %v3803_v7  ;;  %v2105_v34 = vpop.f32.mrb[123].mxu1 }
 0x467   : > { %2189 = vst [vmem:[%s3807_s28 + $0x1c0] sm:$0xff] %v2103_v31  ;;  %v2106_v35 = vadd.f32 %v3803_v7, %v2105_v34 }
 0x468   : > { %2192 = vst [vmem:[%s3807_s28 + $0x1d8] sm:$0xff] %v2114_v33 }
 0x469   : > { %2190 = vst [vmem:[%s3807_s28 + $0x1c8] sm:$0xff] %v2106_v35 }
 0x46b   : > { %v2861_v36 = vpop.f32.mrb[124].mxu1 }
 0x46c   : > { %v2127_v37 = vadd.f32 %v2861_v36, %v3803_v7  ;;  %v2118_v38 = vpop.f32.mrb[125].mxu1 }
 0x46d   : > { %v2119_v39 = vadd.f32 %v3803_v7, %v2118_v38  ;;  %v2862_v40 = vpop.f32.mrb[126].mxu1 }
 0x46e   : > { %2195 = vst [vmem:[%s3807_s28 + $0x1f0] sm:$0xff] %v2127_v37  ;;  %v2130_v41 = vadd.f32 %v2862_v40, %v3803_v7  ;;  %v2121_v42 = vpop.f32.mrb[127].mxu1 }
 0x46f   : > { %2193 = vst [vmem:[%s3807_s28 + $0x1e0] sm:$0xff] %v2119_v39  ;;  %v2122_v43 = vadd.f32 %v3803_v7, %v2121_v42 }
 0x470   : > { %2196 = vst [vmem:[%s3807_s28 + $0x1f8] sm:$0xff] %v2130_v41 }
 0x471   : > { %2194 = vst [vmem:[%s3807_s28 + $0x1e8] sm:$0xff] %v2122_v43 }
 0x472   : > { %3315 = shalt.err (!%p3312_p7)
}
 0x473   : > { %s3316_s8 = scalar_lea.hbm %s3936_s7, 8192  ;;  %s3320_s25 = scalar_lea.hbm %s3989_s3, 16384 }
 0x474   : > { %p3317_p9 = scmp.ne.s32.totalorder %s3936_s7, %s3316_s8  ;;  %p3321_p5 = scmp.lt.u32.totalorder %s3936_s7, %s3989_s3 }
 0x475   : > { %p3322_p11 = scmp.lt.u32.totalorder %s3320_s25, %s3316_s8  ;;  %p3324_p4 = scmp.lt.u32.totalorder %s3316_s8, %s3936_s7 }
 0x476   : > { %p3318_p1 = pnand %p3317_p9, %p3495_p12 }
 0x477   : > { %p3323_p2 = por %p3322_p11, %p3321_p5 }
 0x478   : > { %p3319_p0 = pneg %p3318_p1 }
 0x479   : > { %p3325_p6 = por %p3324_p4, %p3323_p2 }
 0x47b   : > { %p3326_p8 = pnand %p3325_p6, %p3319_p0 }
 0x47d   : > { %3329 = shalt.err (!%p3326_p8)
}
 0x47e   : > { %s3379_s27 = smov 128   ;;  %s3380_s28 = smov 8  }
 0x47f   : > { %2869 = dma.vmem_to_hbm [thread:$0]  (%p3495_p12), %s3938_s29, 8192, %s3936_s7, %s2198_s16, %s3379_s27, %s3379_s27, %s3380_s28  }
 0x480 PF: > { %s2226_s23 = sand.u32 1, %s3360_s12   ;;  %p4004_p10 = scmp.ne.s32.totalorder %s3994_s19, 0 }
 0x481   : > { %p4005_p13 = scmp.ge.s32.totalorder %s3372_s15, 2  ;;  %s2227_s30 = scalar_lea.sflag [#allocation4], %s2226_s23 }
 0x483   : > { %p2880_p3 = pnand %p4005_p13, %p4004_p10 }
 0x485   : > { %3355 = dma.done.wait (!%p2880_p3), %s2227_s30, 8192  }
 0x486   : > { %3357 = vsyncadd (!%p2880_p3), %s2227_s30, 4294959104  ;;  %p17_p7 = scmp.ge.s32.totalorder %s3457_s24, 4   ;;  %s4006_s12 = smov %s3364_s13 }
 0x487   : > { %s4007_s13 = smov %s3368_s14  ;;  %s4008_s14 = smov %s3491_s17 }
 0x488   : > { %s4009_s15 = smov %s3457_s24  ;;  %19 = sbr.rel (!%p17_p7) target bundleno = 6 (0x6), region = 87 }
 0x48f   :  { %2232 = vsyncpa [#allocation3], 1 }
 0x490   :  { %2234 = vsyncpa [#allocation3 + $0x1], 1 }
 0x491   :  { %2235 = vsyncpa [#allocation6], 1 }
 0x492   :  { %2236 = vsyncpa [#allocation4], 1 }
 0x493   :  { %2238 = vsyncpa [#allocation4 + $0x1], 1 }

</bundles_post_ra>
